<compile_context>
chip_gen: v7x
topology: tpu7x:2x2x1
jax: 0.10.0
libtpu: 0.0.40
codegen_flags: <defaults>
</compile_context>

<pallas_src>
import functools

import jax
import jax.numpy as jnp
from jax.experimental import pallas as pl
from jax.experimental.pallas import tpu as pltpu

_VMEM_LIMIT = 32 * 1024 * 1024
_LEAKY_SLOPE = 0.01      # F.leaky_relu default negative_slope
_BN_EPS = 1e-5


# ---------------------------------------------------------------------------
# Kernel 1: row-tiled matmul + bias + activation  (linear / conv1 layers)
# ---------------------------------------------------------------------------
def _matmul_bias_act_kernel(x_ref, w_ref, b_ref, o_ref, *, act):
    y = jnp.dot(x_ref[...], w_ref[...], preferred_element_type=jnp.float32)
    y = y + b_ref[...]                      # (1, N) f32 bias broadcasts over rows
    if act == "leaky_relu":
        y = jnp.where(y > 0, y, _LEAKY_SLOPE * y)
    elif act == "sigmoid":
        y = jax.nn.sigmoid(y)
    o_ref[...] = y.astype(o_ref.dtype)


def matmul_bias_act(x, w, b, act="none", out_dtype=jnp.float32, tm=2048):
    """Fused (M,K)@(K,N) + bias + act.  bf16 MXU operands, f32 accumulate.

    Rows tiled with a large TM (these layers are overhead/bandwidth bound,
    not FLOP bound); the grid axis is 'parallel' (megacore on v7x)."""
    M, K = x.shape
    K2, N = w.shape
    assert K == K2
    TM = min(tm, M)
    if TM != M:
        TM = max(8, (TM // 8) * 8)          # block 8-divisible unless full extent
    grid_m = pl.cdiv(M, TM)

    cost = pl.CostEstimate(
        flops=2 * M * K * N,
        transcendentals=M * N if act == "sigmoid" else 0,
        bytes_accessed=int(2 * (M * K + K * N) + 4 * N
                           + jnp.dtype(out_dtype).itemsize * M * N),
    )
    kernel = functools.partial(_matmul_bias_act_kernel, act=act)
    return pl.pallas_call(
        kernel,
        out_shape=jax.ShapeDtypeStruct((M, N), out_dtype),
        grid=(grid_m,),
        in_specs=[
            pl.BlockSpec((TM, K), lambda i: (i, 0)),
            pl.BlockSpec((K, N), lambda i: (0, 0)),
            pl.BlockSpec((1, N), lambda i: (0, 0)),
        ],
        out_specs=pl.BlockSpec((TM, N), lambda i: (i, 0)),
        compiler_params=pltpu.CompilerParams(
            dimension_semantics=("parallel",),
            vmem_limit_bytes=_VMEM_LIMIT,
        ),
        cost_estimate=cost,
    )(x.astype(jnp.bfloat16), w.astype(jnp.bfloat16),
      b.reshape(1, N).astype(jnp.float32))


# ---------------------------------------------------------------------------
# Kernel 2: row-tiled conv2 (as matmul) + leaky_relu + per-sample partials
#           (fc-weighted sum, BN sum, BN sum-of-squares)
# ---------------------------------------------------------------------------
def _conv2_fused_kernel(p_ref, w_ref, b_ref, fcw_ref, mask_ref,
                        s_ref, rs_ref, rq_ref, *, rows_pad):
    # conv2 matmul: bf16 operands -> f32 accumulator (MXU native path).
    y = jnp.dot(p_ref[...], w_ref[...], preferred_element_type=jnp.float32)
    y = y + b_ref[...]
    y = jnp.where(y > 0, y, _LEAKY_SLOPE * y)            # leaky_relu
    # TODO(synk): F.dropout2d is stochastic; applied as identity here.

    tm, c = y.shape
    tb = tm // rows_pad
    # rows_pad (40) is a multiple of 8 -> this reshape is layout-preserving.
    y3 = y.reshape(tb, rows_pad, c) * mask_ref[...][None]   # zero the pad rows
    # Per-sample segmented sums (replace the old one-hot selector matmul).
    s_ref[...] = jnp.sum(y3 * fcw_ref[...][None], axis=1)   # fc-weighted
    rs_ref[...] = jnp.sum(y3, axis=1)                       # BN sum partial
    rq_ref[...] = jnp.sum(y3 * y3, axis=1)                  # BN sumsq partial


def _pick_sample_tile(batch, target=16):
    """Samples per grid step: 16 (=> 640-row LHS tiles) when it divides batch,
    must be a multiple of 8 unless it covers the whole batch."""
    if batch <= target:
        return batch
    for cand in range(target, 7, -1):
        if cand % 8 == 0 and batch % cand == 0:
            return cand
    return batch   # TODO(synk): ragged batch sizes fall back to one big tile.


def conv2_bn_fc_fused(p2_pad, w2, b2, fcw_pad, row_mask, *, batch, rows_pad, tb):
    M, K = p2_pad.shape          # (B*rows_pad, 576)
    C = w2.shape[1]              # 128
    n_tiles = batch // tb
    TM = tb * rows_pad

    cost = pl.CostEstimate(
        flops=2 * M * K * C + 8 * M * C,
        transcendentals=0,
        bytes_accessed=int(2 * (M * K + K * C)
                           + 4 * (3 * batch * C + 2 * rows_pad * C + C)),
    )
    kernel = functools.partial(_conv2_fused_kernel, rows_pad=rows_pad)
    s, rowsum, rowsq = pl.pallas_call(
        kernel,
        out_shape=(jax.ShapeDtypeStruct((batch, C), jnp.float32),) * 3,
        grid=(n_tiles,),
        in_specs=[
            pl.BlockSpec((TM, K), lambda i: (i, 0)),
            pl.BlockSpec((K, C), lambda i: (0, 0)),
            pl.BlockSpec((1, C), lambda i: (0, 0)),
            pl.BlockSpec((rows_pad, C), lambda i: (0, 0)),
            pl.BlockSpec((rows_pad, C), lambda i: (0, 0)),
        ],
        out_specs=(pl.BlockSpec((tb, C), lambda i: (i, 0)),) * 3,
        compiler_params=pltpu.CompilerParams(
            dimension_semantics=("parallel",),       # no cross-step accumulator
            vmem_limit_bytes=_VMEM_LIMIT,            # keep <= 48 MiB (v7x-safe)
        ),
        cost_estimate=cost,
    )(p2_pad.astype(jnp.bfloat16), w2.astype(jnp.bfloat16),
      b2.reshape(1, C).astype(jnp.float32),
      fcw_pad.astype(jnp.float32), row_mask.astype(jnp.float32))
    return s, rowsum, rowsq


# ---------------------------------------------------------------------------
# Kernel 3: BN finalize + Linear(4608 -> 1) fold + sigmoid  ->  (B, 1)
# ---------------------------------------------------------------------------
def _bn_fc_sigmoid_kernel(s_ref, rs_ref, rq_ref, g_ref, bb_ref, wsum_ref,
                          fcb_ref, o_ref, *, n_elems):
    inv_n = 1.0 / n_elems
    mean = jnp.sum(rs_ref[...], axis=0, keepdims=True) * inv_n          # (1,C)
    var = jnp.sum(rq_ref[...], axis=0, keepdims=True) * inv_n - mean * mean
    var = jnp.maximum(var, 0.0)
    scale = g_ref[...] * jax.lax.rsqrt(var + _BN_EPS)                   # (1,C)
    shift = bb_ref[...] - mean * scale                                  # (1,C)
    const = jnp.sum(shift * wsum_ref[...], axis=1, keepdims=True)       # (1,1)
    logit = jnp.sum(s_ref[...] * scale, axis=1, keepdims=True)          # (B,1)
    o_ref[...] = jax.nn.sigmoid(logit + const + fcb_ref[...])


def bn_fc_sigmoid(s, rowsum, rowsq, gamma, beta, wsum, fc_b, *, n_elems):
    B, C = s.shape
    kernel = functools.partial(_bn_fc_sigmoid_kernel, n_elems=float(n_elems))
    return pl.pallas_call(
        kernel,
        out_shape=jax.ShapeDtypeStruct((B, 1), jnp.float32),
        grid=(1,),
        in_specs=[pl.BlockSpec((B, C), lambda i: (0, 0))] * 3
                 + [pl.BlockSpec((1, C), lambda i: (0, 0))] * 3
                 + [pl.BlockSpec((1, 1), lambda i: (0, 0))],
        out_specs=pl.BlockSpec((B, 1), lambda i: (0, 0)),
        compiler_params=pltpu.CompilerParams(
            dimension_semantics=("arbitrary",),
            vmem_limit_bytes=_VMEM_LIMIT,
        ),
    )(s, rowsum, rowsq,
      gamma.reshape(1, C).astype(jnp.float32),
      beta.reshape(1, C).astype(jnp.float32),
      wsum.reshape(1, C).astype(jnp.float32),
      fc_b.reshape(1, 1).astype(jnp.float32))


# ---------------------------------------------------------------------------
# Glue: NHWC im2col (patch column order (kh, kw, c)) — stays in XLA.
# ---------------------------------------------------------------------------
def im2col_nhwc(x, k, s):
    B, H, W, C = x.shape
    OH = (H - k) // s + 1
    OW = (W - k) // s + 1
    cols = jnp.stack(
        [jnp.stack([x[:, kh:kh + s * OH:s, kw:kw + s * OW:s, :]
                    for kw in range(k)], axis=3)
         for kh in range(k)],
        axis=3,
    )  # (B, OH, OW, KH, KW, C)
    return cols.reshape(B, OH * OW, k * k * C), OH, OW


# ---------------------------------------------------------------------------
# Forward pass (matches Discriminator.forward)
# ---------------------------------------------------------------------------
def discriminator_forward(params, x1, x2):
    B = x1.shape[0]

    # x1 = leaky_relu(Linear(10 -> 784)(x1)); view as (B,28,28,1) NHWC (bf16).
    h = matmul_bias_act(x1, params["lin_w"], params["lin_b"],
                        act="leaky_relu", out_dtype=jnp.bfloat16)
    x1_img = h.reshape(B, 28, 28, 1)

    # torch.cat on channels; with C==1 per input NCHW->NHWC is a pure reshape.
    x2_nhwc = x2.reshape(B, 28, 28, 1).astype(jnp.bfloat16)
    x = jnp.concatenate([x1_img, x2_nhwc], axis=-1)          # (B,28,28,2)

    # conv1: Conv2d(2,64,k=3,s=2) + leaky_relu (+ identity dropout2d), NHWC out.
    p1, oh1, ow1 = im2col_nhwc(x, 3, 2)                      # (B,169,18)
    w1 = params["c1_w"].transpose(0, 2, 3, 1).reshape(64, -1).T   # (18,64)
    y1 = matmul_bias_act(p1.reshape(B * oh1 * ow1, -1), w1, params["c1_b"],
                         act="leaky_relu", out_dtype=jnp.bfloat16)
    # TODO(synk): 64-ch conv1 output is only half a vreg lane-width; pack two
    # spatial rows per 128 lanes (or extract conv2 patches in-kernel) to make
    # its stores lane-dense.
    y1 = y1.reshape(B, oh1, ow1, 64)                         # stays NHWC — no transposes

    # conv2 + leaky_relu (+ identity dropout2d) fused with per-sample
    # BN / fc partial reductions; rows padded 36->40 for 8-aligned tiles.
    p2, oh2, ow2 = im2col_nhwc(y1, 3, 2)                     # (B,36,576), cols=(kh,kw,c)
    rows = oh2 * ow2                                         # 36
    rows_pad = ((rows + 7) // 8) * 8                         # 40
    p2_pad = jnp.pad(p2, ((0, 0), (0, rows_pad - rows), (0, 0)))
    p2_pad = p2_pad.reshape(B * rows_pad, -1)

    w2 = params["c2_w"].transpose(0, 2, 3, 1).reshape(128, -1).T  # (576,128), (kh,kw,c)
    # fc weight per (spatial position, channel).  PyTorch x.view(B,-1) flattens
    # NCHW as (c,h,w), i.e. index = c*36 + h*6 + w  ->  reshape(128,36).T
    fcw = params["fc_w"].reshape(128, rows).T                # (36,128)
    fcw_pad = jnp.pad(fcw, ((0, rows_pad - rows), (0, 0)))
    row_mask = jnp.broadcast_to(
        (jnp.arange(rows_pad) < rows).astype(jnp.float32)[:, None],
        (rows_pad, 128))

    tb = _pick_sample_tile(B)
    s, rowsum, rowsq = conv2_bn_fc_fused(
        p2_pad, w2, params["c2_b"], fcw_pad, row_mask,
        batch=B, rows_pad=rows_pad, tb=tb)

    # BN finalize (training-mode batch stats, biased var) + fc fold + sigmoid.
    wsum = jnp.sum(fcw, axis=0)                              # (128,)
    out = bn_fc_sigmoid(s, rowsum, rowsq, params["bn_g"], params["bn_b"],
                        wsum, params["fc_b"], n_elems=B * rows)
    return out                                               # (B, 1)


# ---------------------------------------------------------------------------
# Deterministic parameter init + smoke test
# ---------------------------------------------------------------------------
def init_params(key):
    ks = jax.random.split(key, 8)
    f32 = jnp.float32
    return {
        "lin_w": 0.05 * jax.random.normal(ks[0], (10, 784), f32),       # Linear(10,784)
        "lin_b": 0.05 * jax.random.normal(ks[1], (784,), f32),
        "c1_w": 0.05 * jax.random.normal(ks[2], (64, 2, 3, 3), f32),    # Conv2d(2,64,3,s=2)
        "c1_b": 0.05 * jax.random.normal(ks[3], (64,), f32),
        "c2_w": 0.05 * jax.random.normal(ks[4], (128, 64, 3, 3), f32),  # Conv2d(64,128,3,s=2)
        "c2_b": 0.05 * jax.random.normal(ks[5], (128,), f32),
        "bn_g": jnp.ones((128,), f32),                                   # BatchNorm2d(128)
        "bn_b": jnp.zeros((128,), f32),
        "fc_w": 0.05 * jax.random.normal(ks[6], (128 * 6 * 6, 1), f32),  # Linear(4608,1)
        "fc_b": 0.05 * jax.random.normal(ks[7], (1,), f32),
    }


if __name__ == "__main__":
    key = jax.random.PRNGKey(0)
    kp, k1, k2 = jax.random.split(key, 3)
    params = init_params(kp)

    B = 2
    x1 = jax.random.normal(k1, (B, 10), jnp.float32)           # condition vector
    x2 = jax.random.normal(k2, (B, 1, 28, 28), jnp.float32)    # image (NCHW)

    out = jax.jit(discriminator_forward)(params, x1, x2)
    out = jax.block_until_ready(out)

    assert out.shape == (B, 1)
    assert bool(jnp.all(jnp.isfinite(out)))
    assert bool(jnp.all((out >= 0.0) & (out <= 1.0)))
    print("KERNEL_OK")
</pallas_src>

<mosaic_0001>
module attributes {stable_mosaic.version = 11 : i64} {
  func.func @_matmul_bias_act_kernel(%arg0: i32, %arg1: memref<2x10xbf16, #tpu.memory_space<vmem>>, %arg2: memref<10x784xbf16, #tpu.memory_space<vmem>>, %arg3: memref<1x784xf32, #tpu.memory_space<vmem>>, %arg4: memref<2x784xbf16, #tpu.memory_space<vmem>>) attributes {dimension_semantics = [#tpu.dimension_semantics<parallel>], iteration_bounds = array<i64: 1>, scalar_prefetch = 0 : i64, scratch_operands = 0 : i64, tpu.core_type = #tpu.core_type<tc>, window_params = [{transform_indices = @transform_0, window_bounds = array<i64: 2, 10>}, {pipeline_mode = #tpu.pipeline_mode<synchronous>, transform_indices = @transform_1, window_bounds = array<i64: 10, 784>}, {pipeline_mode = #tpu.pipeline_mode<synchronous>, transform_indices = @transform_2, window_bounds = array<i64: 1, 784>}, {transform_indices = @transform_3, window_bounds = array<i64: 2, 784>}]} {
    %c0 = arith.constant 0 : index
    %c0_0 = arith.constant 0 : index
    %0 = vector.load %arg1[%c0, %c0_0] : memref<2x10xbf16, #tpu.memory_space<vmem>>, vector<2x10xbf16>
    %c0_1 = arith.constant 0 : index
    %c0_2 = arith.constant 0 : index
    %1 = vector.load %arg2[%c0_1, %c0_2] : memref<10x784xbf16, #tpu.memory_space<vmem>>, vector<10x784xbf16>
    %cst = arith.constant dense<0.000000e+00> : vector<2x784xf32>
    %2 = tpu.matmul %0, %1, %cst {dimension_numbers = #tpu.dot_dimension_numbers<[1], [0], [0], [1], [0, 0, 1, 1], [], []>} : vector<2x10xbf16>, vector<10x784xbf16>, vector<2x784xf32> -> vector<2x784xf32>
    %c0_3 = arith.constant 0 : index
    %c0_4 = arith.constant 0 : index
    %3 = vector.load %arg3[%c0_3, %c0_4] : memref<1x784xf32, #tpu.memory_space<vmem>>, vector<1x784xf32>
    %4 = vector.broadcast %3 : vector<1x784xf32> to vector<2x784xf32>
    %5 = arith.addf %2, %4 : vector<2x784xf32>
    %cst_5 = arith.constant 0.000000e+00 : f32
    %6 = vector.broadcast %cst_5 : f32 to vector<2x784xf32>
    %7 = arith.cmpf ogt, %5, %6 : vector<2x784xf32>
    %cst_6 = arith.constant 0.00999999977 : f32
    %8 = vector.broadcast %cst_6 : f32 to vector<2x784xf32>
    %9 = arith.mulf %8, %5 : vector<2x784xf32>
    %10 = arith.select %7, %5, %9 : vector<2x784xi1>, vector<2x784xf32>
    %11 = arith.truncf %10 : vector<2x784xf32> to vector<2x784xbf16>
    %c0_7 = arith.constant 0 : index
    %c0_8 = arith.constant 0 : index
    %12 = vector.load %arg4[%c0_7, %c0_8] : memref<2x784xbf16, #tpu.memory_space<vmem>>, vector<2x784xbf16>
    tpu.vector_store %arg4[%c0_7, %c0_8], %11 {strides = array<i32>} : memref<2x784xbf16, #tpu.memory_space<vmem>>, vector<2x784xbf16>,
    return
  }
  func.func @transform_0(%arg0: i32) -> (i32, i32) {
    %c0_i32 = arith.constant 0 : i32
    %c0_i32_0 = arith.constant 0 : i32
    return %arg0, %c0_i32 : i32, i32
  }
  func.func @transform_1(%arg0: i32) -> (i32, i32) {
    %c0_i32 = arith.constant 0 : i32
    %c0_i32_0 = arith.constant 0 : i32
    %c0_i32_1 = arith.constant 0 : i32
    return %c0_i32, %c0_i32_0 : i32, i32
  }
  func.func @transform_2(%arg0: i32) -> (i32, i32) {
    %c0_i32 = arith.constant 0 : i32
    %c0_i32_0 = arith.constant 0 : i32
    %c0_i32_1 = arith.constant 0 : i32
    return %c0_i32, %c0_i32_0 : i32, i32
  }
  func.func @transform_3(%arg0: i32) -> (i32, i32) {
    %c0_i32 = arith.constant 0 : i32
    %c0_i32_0 = arith.constant 0 : i32
    return %arg0, %c0_i32 : i32, i32
  }
}

module attributes {stable_mosaic.version = 11 : i64} {
  func.func @_matmul_bias_act_kernel(%arg0: i32, %arg1: memref<338x18xbf16, #tpu.memory_space<vmem>>, %arg2: memref<18x64xbf16, #tpu.memory_space<vmem>>, %arg3: memref<1x64xf32, #tpu.memory_space<vmem>>, %arg4: memref<338x64xbf16, #tpu.memory_space<vmem>>) attributes {dimension_semantics = [#tpu.dimension_semantics<parallel>], iteration_bounds = array<i64: 1>, scalar_prefetch = 0 : i64, scratch_operands = 0 : i64, tpu.core_type = #tpu.core_type<tc>, window_params = [{transform_indices = @transform_0, window_bounds = array<i64: 338, 18>}, {pipeline_mode = #tpu.pipeline_mode<synchronous>, transform_indices = @transform_1, window_bounds = array<i64: 18, 64>}, {pipeline_mode = #tpu.pipeline_mode<synchronous>, transform_indices = @transform_2, window_bounds = array<i64: 1, 64>}, {transform_indices = @transform_3, window_bounds = array<i64: 338, 64>}]} {
    %c0 = arith.constant 0 : index
    %c0_0 = arith.constant 0 : index
    %0 = vector.load %arg1[%c0, %c0_0] : memref<338x18xbf16, #tpu.memory_space<vmem>>, vector<338x18xbf16>
    %c0_1 = arith.constant 0 : index
    %c0_2 = arith.constant 0 : index
    %1 = vector.load %arg2[%c0_1, %c0_2] : memref<18x64xbf16, #tpu.memory_space<vmem>>, vector<18x64xbf16>
    %cst = arith.constant dense<0.000000e+00> : vector<338x64xf32>
    %2 = tpu.matmul %0, %1, %cst {dimension_numbers = #tpu.dot_dimension_numbers<[1], [0], [0], [1], [0, 0, 1, 1], [], []>} : vector<338x18xbf16>, vector<18x64xbf16>, vector<338x64xf32> -> vector<338x64xf32>
    %c0_3 = arith.constant 0 : index
    %c0_4 = arith.constant 0 : index
    %3 = vector.load %arg3[%c0_3, %c0_4] : memref<1x64xf32, #tpu.memory_space<vmem>>, vector<1x64xf32>
    %4 = vector.broadcast %3 : vector<1x64xf32> to vector<338x64xf32>
    %5 = arith.addf %2, %4 : vector<338x64xf32>
    %cst_5 = arith.constant 0.000000e+00 : f32
    %6 = vector.broadcast %cst_5 : f32 to vector<338x64xf32>
    %7 = arith.cmpf ogt, %5, %6 : vector<338x64xf32>
    %cst_6 = arith.constant 0.00999999977 : f32
    %8 = vector.broadcast %cst_6 : f32 to vector<338x64xf32>
    %9 = arith.mulf %8, %5 : vector<338x64xf32>
    %10 = arith.select %7, %5, %9 : vector<338x64xi1>, vector<338x64xf32>
    %11 = arith.truncf %10 : vector<338x64xf32> to vector<338x64xbf16>
    %c0_7 = arith.constant 0 : index
    %c0_8 = arith.constant 0 : index
    %12 = vector.load %arg4[%c0_7, %c0_8] : memref<338x64xbf16, #tpu.memory_space<vmem>>, vector<338x64xbf16>
    tpu.vector_store %arg4[%c0_7, %c0_8], %11 {strides = array<i32>} : memref<338x64xbf16, #tpu.memory_space<vmem>>, vector<338x64xbf16>,
    return
  }
  func.func @transform_0(%arg0: i32) -> (i32, i32) {
    %c0_i32 = arith.constant 0 : i32
    %c0_i32_0 = arith.constant 0 : i32
    return %arg0, %c0_i32 : i32, i32
  }
  func.func @transform_1(%arg0: i32) -> (i32, i32) {
    %c0_i32 = arith.constant 0 : i32
    %c0_i32_0 = arith.constant 0 : i32
    %c0_i32_1 = arith.constant 0 : i32
    return %c0_i32, %c0_i32_0 : i32, i32
  }
  func.func @transform_2(%arg0: i32) -> (i32, i32) {
    %c0_i32 = arith.constant 0 : i32
    %c0_i32_0 = arith.constant 0 : i32
    %c0_i32_1 = arith.constant 0 : i32
    return %c0_i32, %c0_i32_0 : i32, i32
  }
  func.func @transform_3(%arg0: i32) -> (i32, i32) {
    %c0_i32 = arith.constant 0 : i32
    %c0_i32_0 = arith.constant 0 : i32
    return %arg0, %c0_i32 : i32, i32
  }
}

module attributes {stable_mosaic.version = 11 : i64} {
  func.func @_bn_fc_sigmoid_kernel(%arg0: i32, %arg1: memref<2x128xf32, #tpu.memory_space<vmem>>, %arg2: memref<2x128xf32, #tpu.memory_space<vmem>>, %arg3: memref<2x128xf32, #tpu.memory_space<vmem>>, %arg4: memref<1x128xf32, #tpu.memory_space<vmem>>, %arg5: memref<1x128xf32, #tpu.memory_space<vmem>>, %arg6: memref<1x128xf32, #tpu.memory_space<vmem>>, %arg7: memref<1x1xf32, #tpu.memory_space<vmem>>, %arg8: memref<2x1xf32, #tpu.memory_space<vmem>>) attributes {dimension_semantics = [#tpu.dimension_semantics<arbitrary>], iteration_bounds = array<i64: 1>, scalar_prefetch = 0 : i64, scratch_operands = 0 : i64, tpu.core_type = #tpu.core_type<tc>, window_params = [{pipeline_mode = #tpu.pipeline_mode<synchronous>, transform_indices = @transform_0, window_bounds = array<i64: 2, 128>}, {pipeline_mode = #tpu.pipeline_mode<synchronous>, transform_indices = @transform_1, window_bounds = array<i64: 2, 128>}, {pipeline_mode = #tpu.pipeline_mode<synchronous>, transform_indices = @transform_2, window_bounds = array<i64: 2, 128>}, {pipeline_mode = #tpu.pipeline_mode<synchronous>, transform_indices = @transform_3, window_bounds = array<i64: 1, 128>}, {pipeline_mode = #tpu.pipeline_mode<synchronous>, transform_indices = @transform_4, window_bounds = array<i64: 1, 128>}, {pipeline_mode = #tpu.pipeline_mode<synchronous>, transform_indices = @transform_5, window_bounds = array<i64: 1, 128>}, {pipeline_mode = #tpu.pipeline_mode<synchronous>, transform_indices = @transform_6, window_bounds = array<i64: 1, 1>}, {pipeline_mode = #tpu.pipeline_mode<synchronous>, transform_indices = @transform_7, window_bounds = array<i64: 2, 1>}]} {
    %c0 = arith.constant 0 : index
    %c0_0 = arith.constant 0 : index
    %0 = vector.load %arg2[%c0, %c0_0] : memref<2x128xf32, #tpu.memory_space<vmem>>, vector<2x128xf32>
    %cst = arith.constant dense<0.000000e+00> : vector<128xf32>
    %1 = vector.multi_reduction <add>, %0, %cst [0] : vector<2x128xf32> to vector<128xf32>
    %2 = vector.shape_cast %1 : vector<128xf32> to vector<1x128xf32>
    %cst_1 = arith.constant 0.013888889 : f32
    %3 = vector.broadcast %cst_1 : f32 to vector<1x128xf32>
    %4 = arith.mulf %2, %3 : vector<1x128xf32>
    %c0_2 = arith.constant 0 : index
    %c0_3 = arith.constant 0 : index
    %5 = vector.load %arg3[%c0_2, %c0_3] : memref<2x128xf32, #tpu.memory_space<vmem>>, vector<2x128xf32>
    %cst_4 = arith.constant dense<0.000000e+00> : vector<128xf32>
    %6 = vector.multi_reduction <add>, %5, %cst_4 [0] : vector<2x128xf32> to vector<128xf32>
    %7 = vector.shape_cast %6 : vector<128xf32> to vector<1x128xf32>
    %cst_5 = arith.constant 0.013888889 : f32
    %8 = vector.broadcast %cst_5 : f32 to vector<1x128xf32>
    %9 = arith.mulf %7, %8 : vector<1x128xf32>
    %10 = arith.mulf %4, %4 : vector<1x128xf32>
    %11 = arith.subf %9, %10 : vector<1x128xf32>
    %cst_6 = arith.constant 0.000000e+00 : f32
    %12 = vector.broadcast %cst_6 : f32 to vector<1x128xf32>
    %13 = arith.maximumf %11, %12 : vector<1x128xf32>
    %c0_7 = arith.constant 0 : index
    %c0_8 = arith.constant 0 : index
    %14 = vector.load %arg4[%c0_7, %c0_8] : memref<1x128xf32, #tpu.memory_space<vmem>>, vector<1x128xf32>
    %cst_9 = arith.constant 9.99999974E-6 : f32
    %15 = vector.broadcast %cst_9 : f32 to vector<1x128xf32>
    %16 = arith.addf %13, %15 : vector<1x128xf32>
    %17 = math.rsqrt %16 : vector<1x128xf32>
    %18 = arith.mulf %14, %17 : vector<1x128xf32>
    %c0_10 = arith.constant 0 : index
    %c0_11 = arith.constant 0 : index
    %19 = vector.load %arg5[%c0_10, %c0_11] : memref<1x128xf32, #tpu.memory_space<vmem>>, vector<1x128xf32>
    %20 = arith.mulf %4, %18 : vector<1x128xf32>
    %21 = arith.subf %19, %20 : vector<1x128xf32>
    %c0_12 = arith.constant 0 : index
    %c0_13 = arith.constant 0 : index
    %22 = vector.load %arg6[%c0_12, %c0_13] : memref<1x128xf32, #tpu.memory_space<vmem>>, vector<1x128xf32>
    %23 = arith.mulf %21, %22 : vector<1x128xf32>
    %cst_14 = arith.constant dense<0.000000e+00> : vector<1xf32>
    %24 = vector.multi_reduction <add>, %23, %cst_14 [1] : vector<1x128xf32> to vector<1xf32>
    %25 = vector.shape_cast %24 : vector<1xf32> to vector<1x1xf32>
    %c0_15 = arith.constant 0 : index
    %c0_16 = arith.constant 0 : index
    %26 = vector.load %arg1[%c0_15, %c0_16] : memref<2x128xf32, #tpu.memory_space<vmem>>, vector<2x128xf32>
    %27 = vector.broadcast %18 : vector<1x128xf32> to vector<2x128xf32>
    %28 = arith.mulf %26, %27 : vector<2x128xf32>
    %cst_17 = arith.constant dense<0.000000e+00> : vector<2xf32>
    %29 = vector.multi_reduction <add>, %28, %cst_17 [1] : vector<2x128xf32> to vector<2xf32>
    %30 = vector.shape_cast %29 : vector<2xf32> to vector<2x1xf32>
    %31 = vector.broadcast %25 : vector<1x1xf32> to vector<2x1xf32>
    %32 = arith.addf %30, %31 : vector<2x1xf32>
    %c0_18 = arith.constant 0 : index
    %c0_19 = arith.constant 0 : index
    %33 = vector.load %arg7[%c0_18, %c0_19] : memref<1x1xf32, #tpu.memory_space<vmem>>, vector<1x1xf32>
    %34 = vector.broadcast %33 : vector<1x1xf32> to vector<2x1xf32>
    %35 = arith.addf %32, %34 : vector<2x1xf32>
    %36 = arith.negf %35 : vector<2x1xf32>
    %37 = math.exp %36 : vector<2x1xf32>
    %cst_20 = arith.constant 1.000000e+00 : f32
    %38 = vector.broadcast %cst_20 : f32 to vector<2x1xf32>
    %39 = arith.addf %38, %37 : vector<2x1xf32>
    %40 = arith.divf %38, %39 : vector<2x1xf32>
    %c0_21 = arith.constant 0 : index
    %c0_22 = arith.constant 0 : index
    %41 = vector.load %arg8[%c0_21, %c0_22] : memref<2x1xf32, #tpu.memory_space<vmem>>, vector<2x1xf32>
    tpu.vector_store %arg8[%c0_21, %c0_22], %40 {strides = array<i32>} : memref<2x1xf32, #tpu.memory_space<vmem>>, vector<2x1xf32>,
    return
  }
  func.func @transform_0(%arg0: i32) -> (i32, i32) {
    %c0_i32 = arith.constant 0 : i32
    %c0_i32_0 = arith.constant 0 : i32
    %c0_i32_1 = arith.constant 0 : i32
    return %c0_i32, %c0_i32_0 : i32, i32
  }
  func.func @transform_1(%arg0: i32) -> (i32, i32) {
    %c0_i32 = arith.constant 0 : i32
    %c0_i32_0 = arith.constant 0 : i32
    %c0_i32_1 = arith.constant 0 : i32
    return %c0_i32, %c0_i32_0 : i32, i32
  }
  func.func @transform_2(%arg0: i32) -> (i32, i32) {
    %c0_i32 = arith.constant 0 : i32
    %c0_i32_0 = arith.constant 0 : i32
    %c0_i32_1 = arith.constant 0 : i32
    return %c0_i32, %c0_i32_0 : i32, i32
  }
  func.func @transform_3(%arg0: i32) -> (i32, i32) {
    %c0_i32 = arith.constant 0 : i32
    %c0_i32_0 = arith.constant 0 : i32
    %c0_i32_1 = arith.constant 0 : i32
    return %c0_i32, %c0_i32_0 : i32, i32
  }
  func.func @transform_4(%arg0: i32) -> (i32, i32) {
    %c0_i32 = arith.constant 0 : i32
    %c0_i32_0 = arith.constant 0 : i32
    %c0_i32_1 = arith.constant 0 : i32
    return %c0_i32, %c0_i32_0 : i32, i32
  }
  func.func @transform_5(%arg0: i32) -> (i32, i32) {
    %c0_i32 = arith.constant 0 : i32
    %c0_i32_0 = arith.constant 0 : i32
    %c0_i32_1 = arith.constant 0 : i32
    return %c0_i32, %c0_i32_0 : i32, i32
  }
  func.func @transform_6(%arg0: i32) -> (i32, i32) {
    %c0_i32 = arith.constant 0 : i32
    %c0_i32_0 = arith.constant 0 : i32
    %c0_i32_1 = arith.constant 0 : i32
    return %c0_i32, %c0_i32_0 : i32, i32
  }
  func.func @transform_7(%arg0: i32) -> (i32, i32) {
    %c0_i32 = arith.constant 0 : i32
    %c0_i32_0 = arith.constant 0 : i32
    %c0_i32_1 = arith.constant 0 : i32
    return %c0_i32, %c0_i32_0 : i32, i32
  }
}

module attributes {stable_mosaic.version = 11 : i64} {
  func.func @_conv2_fused_kernel(%arg0: i32, %arg1: memref<80x576xbf16, #tpu.memory_space<vmem>>, %arg2: memref<576x128xbf16, #tpu.memory_space<vmem>>, %arg3: memref<1x128xf32, #tpu.memory_space<vmem>>, %arg4: memref<40x128xf32, #tpu.memory_space<vmem>>, %arg5: memref<40x128xf32, #tpu.memory_space<vmem>>, %arg6: memref<2x128xf32, #tpu.memory_space<vmem>>, %arg7: memref<2x128xf32, #tpu.memory_space<vmem>>, %arg8: memref<2x128xf32, #tpu.memory_space<vmem>>) attributes {dimension_semantics = [#tpu.dimension_semantics<parallel>], iteration_bounds = array<i64: 1>, scalar_prefetch = 0 : i64, scratch_operands = 0 : i64, tpu.core_type = #tpu.core_type<tc>, window_params = [{transform_indices = @transform_0, window_bounds = array<i64: 80, 576>}, {pipeline_mode = #tpu.pipeline_mode<synchronous>, transform_indices = @transform_1, window_bounds = array<i64: 576, 128>}, {pipeline_mode = #tpu.pipeline_mode<synchronous>, transform_indices = @transform_2, window_bounds = array<i64: 1, 128>}, {pipeline_mode = #tpu.pipeline_mode<synchronous>, transform_indices = @transform_3, window_bounds = array<i64: 40, 128>}, {pipeline_mode = #tpu.pipeline_mode<synchronous>, transform_indices = @transform_4, window_bounds = array<i64: 40, 128>}, {transform_indices = @transform_5, window_bounds = array<i64: 2, 128>}, {transform_indices = @transform_6, window_bounds = array<i64: 2, 128>}, {transform_indices = @transform_7, window_bounds = array<i64: 2, 128>}]} {
    %c0 = arith.constant 0 : index
    %c0_0 = arith.constant 0 : index
    %0 = vector.load %arg1[%c0, %c0_0] : memref<80x576xbf16, #tpu.memory_space<vmem>>, vector<80x576xbf16>
    %c0_1 = arith.constant 0 : index
    %c0_2 = arith.constant 0 : index
    %1 = vector.load %arg2[%c0_1, %c0_2] : memref<576x128xbf16, #tpu.memory_space<vmem>>, vector<576x128xbf16>
    %cst = arith.constant dense<0.000000e+00> : vector<80x128xf32>
    %2 = tpu.matmul %0, %1, %cst {dimension_numbers = #tpu.dot_dimension_numbers<[1], [0], [0], [1], [0, 0, 1, 1], [], []>} : vector<80x576xbf16>, vector<576x128xbf16>, vector<80x128xf32> -> vector<80x128xf32>
    %c0_3 = arith.constant 0 : index
    %c0_4 = arith.constant 0 : index
    %3 = vector.load %arg3[%c0_3, %c0_4] : memref<1x128xf32, #tpu.memory_space<vmem>>, vector<1x128xf32>
    %4 = vector.broadcast %3 : vector<1x128xf32> to vector<80x128xf32>
    %5 = arith.addf %2, %4 : vector<80x128xf32>
    %cst_5 = arith.constant 0.000000e+00 : f32
    %6 = vector.broadcast %cst_5 : f32 to vector<80x128xf32>
    %7 = arith.cmpf ogt, %5, %6 : vector<80x128xf32>
    %cst_6 = arith.constant 0.00999999977 : f32
    %8 = vector.broadcast %cst_6 : f32 to vector<80x128xf32>
    %9 = arith.mulf %8, %5 : vector<80x128xf32>
    %10 = arith.select %7, %5, %9 : vector<80x128xi1>, vector<80x128xf32>
    %11 = vector.shape_cast %10 : vector<80x128xf32> to vector<2x40x128xf32>
    %c0_7 = arith.constant 0 : index
    %c0_8 = arith.constant 0 : index
    %12 = vector.load %arg5[%c0_7, %c0_8] : memref<40x128xf32, #tpu.memory_space<vmem>>, vector<40x128xf32>
    %13 = vector.shape_cast %12 : vector<40x128xf32> to vector<1x40x128xf32>
    %14 = vector.broadcast %13 : vector<1x40x128xf32> to vector<2x40x128xf32>
    %15 = arith.mulf %11, %14 : vector<2x40x128xf32>
    %c0_9 = arith.constant 0 : index
    %c0_10 = arith.constant 0 : index
    %16 = vector.load %arg4[%c0_9, %c0_10] : memref<40x128xf32, #tpu.memory_space<vmem>>, vector<40x128xf32>
    %17 = vector.shape_cast %16 : vector<40x128xf32> to vector<1x40x128xf32>
    %18 = vector.broadcast %17 : vector<1x40x128xf32> to vector<2x40x128xf32>
    %19 = arith.mulf %15, %18 : vector<2x40x128xf32>
    %cst_11 = arith.constant dense<0.000000e+00> : vector<2x128xf32>
    %20 = vector.multi_reduction <add>, %19, %cst_11 [1] : vector<2x40x128xf32> to vector<2x128xf32>
    %c0_12 = arith.constant 0 : index
    %c0_13 = arith.constant 0 : index
    %21 = vector.load %arg6[%c0_12, %c0_13] : memref<2x128xf32, #tpu.memory_space<vmem>>, vector<2x128xf32>
    tpu.vector_store %arg6[%c0_12, %c0_13], %20 {strides = array<i32>} : memref<2x128xf32, #tpu.memory_space<vmem>>, vector<2x128xf32>,
    %cst_14 = arith.constant dense<0.000000e+00> : vector<2x128xf32>
    %22 = vector.multi_reduction <add>, %15, %cst_14 [1] : vector<2x40x128xf32> to vector<2x128xf32>
    %c0_15 = arith.constant 0 : index
    %c0_16 = arith.constant 0 : index
    %23 = vector.load %arg7[%c0_15, %c0_16] : memref<2x128xf32, #tpu.memory_space<vmem>>, vector<2x128xf32>
    tpu.vector_store %arg7[%c0_15, %c0_16], %22 {strides = array<i32>} : memref<2x128xf32, #tpu.memory_space<vmem>>, vector<2x128xf32>,
    %24 = arith.mulf %15, %15 : vector<2x40x128xf32>
    %cst_17 = arith.constant dense<0.000000e+00> : vector<2x128xf32>
    %25 = vector.multi_reduction <add>, %24, %cst_17 [1] : vector<2x40x128xf32> to vector<2x128xf32>
    %c0_18 = arith.constant 0 : index
    %c0_19 = arith.constant 0 : index
    %26 = vector.load %arg8[%c0_18, %c0_19] : memref<2x128xf32, #tpu.memory_space<vmem>>, vector<2x128xf32>
    tpu.vector_store %arg8[%c0_18, %c0_19], %25 {strides = array<i32>} : memref<2x128xf32, #tpu.memory_space<vmem>>, vector<2x128xf32>,
    return
  }
  func.func @transform_0(%arg0: i32) -> (i32, i32) {
    %c0_i32 = arith.constant 0 : i32
    %c0_i32_0 = arith.constant 0 : i32
    return %arg0, %c0_i32 : i32, i32
  }
  func.func @transform_1(%arg0: i32) -> (i32, i32) {
    %c0_i32 = arith.constant 0 : i32
    %c0_i32_0 = arith.constant 0 : i32
    %c0_i32_1 = arith.constant 0 : i32
    return %c0_i32, %c0_i32_0 : i32, i32
  }
  func.func @transform_2(%arg0: i32) -> (i32, i32) {
    %c0_i32 = arith.constant 0 : i32
    %c0_i32_0 = arith.constant 0 : i32
    %c0_i32_1 = arith.constant 0 : i32
    return %c0_i32, %c0_i32_0 : i32, i32
  }
  func.func @transform_3(%arg0: i32) -> (i32, i32) {
    %c0_i32 = arith.constant 0 : i32
    %c0_i32_0 = arith.constant 0 : i32
    %c0_i32_1 = arith.constant 0 : i32
    return %c0_i32, %c0_i32_0 : i32, i32
  }
  func.func @transform_4(%arg0: i32) -> (i32, i32) {
    %c0_i32 = arith.constant 0 : i32
    %c0_i32_0 = arith.constant 0 : i32
    %c0_i32_1 = arith.constant 0 : i32
    return %c0_i32, %c0_i32_0 : i32, i32
  }
  func.func @transform_5(%arg0: i32) -> (i32, i32) {
    %c0_i32 = arith.constant 0 : i32
    %c0_i32_0 = arith.constant 0 : i32
    return %arg0, %c0_i32 : i32, i32
  }
  func.func @transform_6(%arg0: i32) -> (i32, i32) {
    %c0_i32 = arith.constant 0 : i32
    %c0_i32_0 = arith.constant 0 : i32
    return %arg0, %c0_i32 : i32, i32
  }
  func.func @transform_7(%arg0: i32) -> (i32, i32) {
    %c0_i32 = arith.constant 0 : i32
    %c0_i32_0 = arith.constant 0 : i32
    return %arg0, %c0_i32 : i32, i32
  }
}

</mosaic_0001>

<bundles_post_ra>
// kernel: discriminator_forward.4
= control target key start
LH: loop header
LB: loop body
LE: loop exit
PB: predicated region body
PF: predicated region fallthrough
CT: control target
= control target key end

     0   :  { %vm94_vm0 = vcmask 1044480   ;;  %v420_v1 = vmov 0   ;;  %vm90_vm1 = vcmask 80896   ;;  %v421_v10 = vmov 0.0   ;;  %s495_s1 = inlined_call_operand.vmem [shape: bf16[10,784], index: 1, kind: input, shape index: {}]   ;;  %s496_s0 = inlined_call_operand.vmem [shape: bf16[2,10], index: 0, kind: input, shape index: {}]   ;;  %s497_s2 = inlined_call_operand.vmem [shape: f32[1,784], index: 2, kind: input, shape index: {}]   ;;  %s498_s3 = inlined_call_operand.vmem [shape: bf16[2,784], index: 3, kind: output, shape index: {}]  }
   0x1   :  { %v410_v0 = vld [vmem:[%s495_s1 + $0x4] ss:$28 sps:$4 sm:$0x1f]   ;;  %148 = vmatprep.mubr.bf16.mxu0 %v420_v1  ;;  %189 = vmatprep.mubr.bf16.mxu1 %v420_v1  ;;  %v412_v2 = vld [vmem:[%s495_s1 + $0xc] ss:$28 sps:$4 sm:$0x1f]   ;;  %v26_v14 = vlaneseq }
   0x2   :  { %388 = vmatprep.subr.msk.bf16.mxu0 %vm94_vm0, %v410_v0  ;;  %v414_v3 = vld [vmem:[%s495_s1] ss:$28 sps:$4 sm:$0x1f]   ;;  %v415_v4 = vld [vmem:[%s495_s1 + $0x8] ss:$28 sps:$4 sm:$0x1f]   ;;  %390 = vmatprep.subr.msk.bf16.mxu1 %vm94_vm0, %v412_v2 }
   0x3   :  { %v15_v5 = vld [vmem:[%s496_s0] sm:$0x1]  ;;  %v96_v6 = vsel %vm94_vm0, %v414_v3, 0  ;;  %v102_v7 = vsel %vm94_vm0, %v415_v4, 0  ;;  %vm422_vm2 = vmmov 0   ;;  %v27_v15 = vshrl.u32 %v26_v14, 7 }
   0x4   :  { %v416_v8 = vld [vmem:[%s495_s1 + $0x14] ss:$28 sps:$4 sm:$0x1f]   ;;  %117 = vmatpush1.bf16.msra.mxu0 %v96_v6  ;;  %158 = vmatpush1.bf16.msra.mxu1 %v102_v7  ;;  %v423_v16 = vmov 1966171168   ;;  %vm363_vm3 = vcmask 1040384  }
   0x5   :  { %v418_v9 = vld [vmem:[%s495_s1 + $0x10] ss:$28 sps:$4 sm:$0x1f]   ;;  %392 = vmatprep.subr.msk.bf16.mxu0 %vm94_vm0, %v416_v8  ;;  %400 = vmatprep.subr.bf16.mxu1 %v421_v10  ;;  %v419_v11 = vld [vmem:[%s495_s1 + $0x18] ss:$28 sps:$4 sm:$0x1f]   ;;  %v318_v17 = vunpack.c.l.s4 %v423_v16 }
   0x6   :  { %v108_v12 = vsel %vm94_vm0, %v418_v9, 0  ;;  %v114_v13 = vsel %vm94_vm0, %v419_v11, 0  ;;  %v28_v18 = vsub.s32 0, %v27_v15  ;;  %v36_v19 = vsub.s32 2, %v27_v15  ;;  %v24_v20 = vld [vmem:[%s497_s2] sm:$0x7f] }
   0x7   :  { %389 = vmatmul.mubr.msk.bf16.vlgmr.msra.gmra.mrb[0].mxu0 %vm90_vm1, %v15_v5  ;;  %391 = vmatmul.mubr.msk.bf16.vlgmr.msra.gmra.mrb[0].mxu1 %vm90_vm1, %v15_v5  ;;  %v32_v21 = vsub.s32 1, %v27_v15  ;;  %v40_v22 = vsub.s32 3, %v27_v15  ;;  %v319_v23 = vunpack.c.0.s8 %v318_v17  ;;  %v44_v31 = vsub.s32 4, %v27_v15 }
   0x8   :  { %199 = vmatpush1.bf16.msra.mxu0 %v108_v12  ;;  %401 = vmatpush3.bf16.msra.mxu1 %v114_v13  ;;  %v29_v24 = vrot.slane %v24_v20, %v28_v18  ;;  %v37_v25 = vrot.slane %v24_v20, %v36_v19  ;;  %v52_v36 = vsub.s32 6, %v27_v15  ;;  %v48_v37 = vsub.s32 5, %v27_v15 }
   0x9   :  { %230 = vmatprep.mubr.bf16.mxu0 %v420_v1  ;;  %402 = vmatprep.mubr.msk.bf16.mxu1 %vm422_vm2, %v421_v10  ;;  %v33_v26 = vrot.slane %v24_v20, %v32_v21  ;;  %v41_v27 = vrot.slane %v24_v20, %v40_v22  ;;  %v482_v30 = vsub.s32 %v319_v23, %v27_v15  ;;  %vm364_vm4 = vcmask 1041409  }
   0xa   :  { %v45_v50 = vrot.slane %v24_v20, %v44_v31  ;;  %v53_v51 = vrot.slane %v24_v20, %v52_v36  ;;  %v49_v54 = vrot.slane %v24_v20, %v48_v37  ;;  %vm365_vm9 = vmor %vm364_vm4, %vm363_vm3  ;;  %vm366_vm10 = vcmask 1042434  }
   0xb   :  { %vm367_vm11 = vmor %vm366_vm10, %vm365_vm9  ;;  %vm368_vm12 = vcmask 1043459   ;;  %vm372_vm3 = vcmask 1045509  }
   0xc   :  { %vm369_vm0 = vmor %vm368_vm12, %vm367_vm11 }
   0xf   :  { %393 = vmatmul.mubr.msk.bf16.vlgmr.msra.gmra.mrb[4].mxu0 %vm90_vm1, %v15_v5  ;;  %403 = vmatmul.mubr.msk.bf16.vlgmr.msra.gmra.mrb[4].mxu1 %vm90_vm1, %v15_v5  ;;  %vm370_vm1 = vcmask 1044484  }
  0x10   :  { %vm371_vm2 = vmor %vm370_vm1, %vm369_vm0 }
  0x11   :  { %vm373_vm4 = vmor %vm372_vm3, %vm371_vm2 }
  0xda   :  { %v150_v28 = vpop.f32.mrb[0].mxu0  ;;  %v191_v29 = vpop.f32.mrb[0].mxu1 }
  0xdb   :  { %v151_v32 = vadd.f32 %v150_v28, %v29_v24  ;;  %v192_v33 = vadd.f32 %v191_v29, %v37_v25  ;;  %v152_v34 = vpop.f32.mrb[1].mxu0  ;;  %v193_v35 = vpop.f32.mrb[1].mxu1 }
  0xdc   :  { %v153_v38 = vadd.f32 %v152_v34, %v33_v26  ;;  %v194_v39 = vadd.f32 %v193_v35, %v41_v27  ;;  %v154_v40 = vpop.f32.mrb[2].mxu0  ;;  %v195_v41 = vpop.f32.mrb[2].mxu1 }
  0xdd   :  { %vm279_vm5 = vcmp.gt.f32.partialorder %v151_v32, 0.0  ;;  %v286_v42 = vmul.f32 0.01, %v151_v32  ;;  %vm281_vm6 = vcmp.gt.f32.partialorder %v192_v33, 0.0  ;;  %v288_v43 = vmul.f32 0.01, %v192_v33 }
  0xde   :  { %vm280_vm7 = vcmp.gt.f32.partialorder %v153_v38, 0.0  ;;  %v287_v44 = vmul.f32 0.01, %v153_v38  ;;  %vm282_vm8 = vcmp.gt.f32.partialorder %v194_v39, 0.0  ;;  %v289_v45 = vmul.f32 0.01, %v194_v39 }
  0xdf   :  { %v293_v46 = vsel %vm279_vm5, %v151_v32, %v286_v42  ;;  %v295_v47 = vsel %vm281_vm6, %v192_v33, %v288_v43  ;;  %v155_v48 = vpop.f32.mrb[3].mxu0  ;;  %v196_v49 = vpop.f32.mrb[3].mxu1  ;;  %vm374_vm5 = vcmask 129030  }
  0xe0   :  { %v294_v52 = vsel %vm280_vm7, %v153_v38, %v287_v44  ;;  %v296_v53 = vsel %vm282_vm8, %v194_v39, %v289_v45  ;;  %vm375_vm6 = vmor %vm374_vm5, %vm373_vm4 }
  0xe1   :  { %v395_v55 = vpack.c.bf16 %v294_v52, %v293_v46  ;;  %v396_v56 = vpack.c.bf16 %v296_v53, %v295_v47 }
  0xe2   :  { %v232_v57 = vpop.f32.mrb[4].mxu0  ;;  %v273_v58 = vpop.f32.mrb[4].mxu1 }
  0xe3   :  { %v323_v59 = vrot.slane %v395_v55, %v482_v30  ;;  %v330_v60 = vrot.slane %v396_v56, %v482_v30  ;;  %v233_v61 = vadd.f32 %v232_v57, %v45_v50  ;;  %v274_v62 = vadd.f32 %v273_v58, %v53_v51  ;;  %v234_v63 = vpop.f32.mrb[5].mxu0  ;;  %v404_v0 = vpop.f32.mrb[5].mxu1 }
  0xe4   :  { %v235_v1 = vadd.f32 %v234_v63, %v49_v54  ;;  %v236_v2 = vpop.f32.mrb[6].mxu0  ;;  %v276_v3 = vpop.f32.mrb[6].mxu1 }
  0xe5   :  { %v345_v4 = vcombine.low %v323_v59, %v330_v60  ;;  %vm283_vm13 = vcmp.gt.f32.partialorder %v233_v61, 0.0  ;;  %v290_v5 = vmul.f32 0.01, %v233_v61  ;;  %vm285_vm14 = vcmp.gt.f32.partialorder %v274_v62, 0.0  ;;  %v237_v6 = vpop.f32.mrb[7].mxu0  ;;  %v405_v7 = vpop.f32.mrb[7].mxu1 }
  0xe6   :  { %v292_v8 = vmul.f32 0.01, %v274_v62  ;;  %vm284_vm15 = vcmp.gt.f32.partialorder %v235_v1, 0.0  ;;  %v291_v9 = vmul.f32 0.01, %v235_v1 }
  0xe7   :  { %v297_v10 = vsel %vm283_vm13, %v233_v61, %v290_v5  ;;  %v353_v18 = vrot.slane %v345_v4, %v482_v30 }
  0xe8   :  { %v299_v11 = vsel %vm285_vm14, %v274_v62, %v292_v8  ;;  %v298_v12 = vsel %vm284_vm15, %v235_v1, %v291_v9 }
  0xe9   :  { %v306_v13 = vpack.c.bf16 %v299_v11, %v299_v11  ;;  %v397_v14 = vpack.c.bf16 %v298_v12, %v297_v10 }
  0xeb   :  { %v344_v15 = vrot.slane %v306_v13, %v482_v30  ;;  %v337_v16 = vrot.slane %v397_v14, %v482_v30 }
  0xed   :  { %v346_v17 = vcombine.low %v337_v16, %v344_v15 }
  0xef   :  { %v360_v19 = vrot.slane %v346_v17, %v482_v30 }
  0xf1   :  { %v361_v20 = vcombine.low %v353_v18, %v360_v19 }
  0xf3   :  { %376 = vst.msk [vmem:[%s498_s3] sm:$0x7f] %vm375_vm6, %v361_v20 }

// kernel: discriminator_forward.5
= control target key start
LH: loop header
LB: loop body
LE: loop exit
PB: predicated region body
PF: predicated region fallthrough
CT: control target
= control target key end

     0   :  { %vm252_vm0 = vcmask 1040384   ;;  %vm185_vm1 = vcmask 146432   ;;  %vm766_vm2 = vcmask 519168   ;;  %s1391_s1 = inlined_call_operand.vmem [shape: bf16[18,64], index: 1, kind: input, shape index: {}]   ;;  %s1392_s0 = inlined_call_operand.vmem [shape: bf16[338,18], index: 0, kind: input, shape index: {}]   ;;  %s1393_s2 = inlined_call_operand.vmem [shape: f32[1,64], index: 2, kind: input, shape index: {}]   ;;  %s1394_s3 = inlined_call_operand.vmem [shape: bf16[338,64], index: 3, kind: output, shape index: {}]  }
   0x1   :  { %v1026_v0 = vld [vmem:[%s1391_s1] sm:$0xff]   ;;  %v1027_v1 = vld [vmem:[%s1391_s1 + $0x8] ss:$0 sps:$4 sm:$0x11]   ;;  %v1032_v7 = vld [vmem:[%s1392_s0 + $0x10] sm:$0xff]  }
   0x2   :  { %v1028_v2 = vld [vmem:[%s1392_s0] sm:$0xff]   ;;  %972 = vmatprep.subr.bf16.mxu0 %v1026_v0  ;;  %1020 = vmatprep.subr.bf16.mxu1 %v1026_v0  ;;  %v254_v3 = vsel %vm252_vm0, %v1027_v1, 0  ;;  %v1029_v5 = vld [vmem:[%s1392_s0 + $0x8] sm:$0xff]   ;;  %v1034_v8 = vld [vmem:[%s1392_s0 + $0x70] sm:$0xff]  }
   0x3   :  { %973 = vmatpush3.bf16.msra.mxu0 %v1026_v0  ;;  %1022 = vmatpush3.bf16.msra.mxu1 %v1026_v0  ;;  %v1030_v4 = vld [vmem:[%s1392_s0 + $0x60] sm:$0xff]   ;;  %v1031_v6 = vld [vmem:[%s1392_s0 + $0x68] sm:$0xff]   ;;  %v1033_v9 = vld [vmem:[%s1392_s0 + $0x18] sm:$0xff]  }
   0x4   :  { %1024 = vmatprep.subr.msk.bf16.mxu0 %vm252_vm0, %v1027_v1  ;;  %1025 = vmatprep.subr.msk.bf16.mxu1 %vm252_vm0, %v1027_v1  ;;  %v1035_v10 = vld [vmem:[%s1392_s0 + $0x78] sm:$0xff]   ;;  %v1036_v11 = vld [vmem:[%s1392_s0 + $0x20] sm:$0xff]   ;;  %v1037_v13 = vld [vmem:[%s1392_s0 + $0x28] sm:$0xff]  }
   0x5   :  { %976 = vmatprep.mubr.msk.bf16.mxu0 %vm185_vm1, %v1028_v2  ;;  %1000 = vmatprep.mubr.msk.bf16.mxu1 %vm185_vm1, %v1030_v4  ;;  %v1038_v12 = vld [vmem:[%s1392_s0 + $0x80] sm:$0xff]   ;;  %v1039_v14 = vld [vmem:[%s1392_s0 + $0x88] sm:$0xff]   ;;  %v1040_v15 = vld [vmem:[%s1392_s0 + $0x30] sm:$0xff]  }
   0x6   :  { %v1042_v16 = vld [vmem:[%s1392_s0 + $0x90] sm:$0xff]   ;;  %v1041_v17 = vld [vmem:[%s1392_s0 + $0x38] sm:$0xff]   ;;  %v1044_v19 = vld [vmem:[%s1392_s0 + $0x40] sm:$0xff]  }
   0x7   :  { %975 = vmatpush3.bf16.msra.mxu0 %v254_v3  ;;  %1023 = vmatpush3.bf16.msra.mxu1 %v254_v3  ;;  %v1043_v18 = vld [vmem:[%s1392_s0 + $0x98] sm:$0xff]   ;;  %v1046_v20 = vld [vmem:[%s1392_s0 + $0xa0] sm:$0xff]   ;;  %v1045_v21 = vld [vmem:[%s1392_s0 + $0x48] sm:$0xff]  }
   0x8   :  { %v1047_v22 = vld [vmem:[%s1392_s0 + $0xa8] ss:$0 sps:$4 sm:$0x11]   ;;  %v1048_v23 = vld [vmem:[%s1392_s0 + $0x50] sm:$0xff]   ;;  %v1049_v24 = vld [vmem:[%s1392_s0 + $0x58] sm:$0xff]  }
   0x9   :  { %v1167_v25 = vld [vmem:[%s1393_s2] ss:$0 sm:$0xff] }
   0xa   :  { %977 = vmatmul.mubr.msk.bf16.vlgmr.msra.gmra.mrb[0].mxu0 %vm185_vm1, %v1029_v5  ;;  %1001 = vmatmul.mubr.msk.bf16.vlgmr.msra.gmra.mrb[0].mxu1 %vm185_vm1, %v1031_v6 }
   0xb   :  { %980 = vmatprep.mubr.msk.bf16.mxu0 %vm185_vm1, %v1032_v7  ;;  %1004 = vmatprep.mubr.msk.bf16.mxu1 %vm185_vm1, %v1034_v8 }
  0x12   :  { %981 = vmatmul.mubr.msk.bf16.gmra.mrb[4].mxu0 %vm185_vm1, %v1033_v9  ;;  %1005 = vmatmul.mubr.msk.bf16.gmra.mrb[4].mxu1 %vm185_vm1, %v1035_v10 }
  0x13   :  { %984 = vmatprep.mubr.msk.bf16.mxu0 %vm185_vm1, %v1036_v11  ;;  %1008 = vmatprep.mubr.msk.bf16.mxu1 %vm185_vm1, %v1038_v12 }
  0x1a   :  { %985 = vmatmul.mubr.msk.bf16.gmra.mrb[8].mxu0 %vm185_vm1, %v1037_v13  ;;  %1009 = vmatmul.mubr.msk.bf16.gmra.mrb[8].mxu1 %vm185_vm1, %v1039_v14 }
  0x1b   :  { %988 = vmatprep.mubr.msk.bf16.mxu0 %vm185_vm1, %v1040_v15  ;;  %1012 = vmatprep.mubr.msk.bf16.mxu1 %vm185_vm1, %v1042_v16 }
  0x22   :  { %989 = vmatmul.mubr.msk.bf16.gmra.mrb[12].mxu0 %vm185_vm1, %v1041_v17  ;;  %1013 = vmatmul.mubr.msk.bf16.gmra.mrb[12].mxu1 %vm185_vm1, %v1043_v18 }
  0x23   :  { %992 = vmatprep.mubr.msk.bf16.mxu0 %vm185_vm1, %v1044_v19  ;;  %1016 = vmatprep.mubr.msk.bf16.mxu1 %vm185_vm1, %v1046_v20 }
  0x2a   :  { %993 = vmatmul.mubr.msk.bf16.gmra.mrb[16].mxu0 %vm185_vm1, %v1045_v21  ;;  %1017 = vmatmul.mubr.msk.bf16.gmra.mrb[16].mxu1 %vm185_vm1, %v1047_v22 }
  0x2b   :  { %996 = vmatprep.mubr.msk.bf16.mxu0 %vm185_vm1, %v1048_v23 }
  0x32   :  { %997 = vmatmul.mubr.msk.bf16.gmra.mrb[20].mxu0 %vm185_vm1, %v1049_v24 }
  0xdd   :  { %v978_v26 = vpop.f32.mrb[0].mxu0  ;;  %v1002_v27 = vpop.f32.mrb[0].mxu1 }
  0xde   :  { %v299_v28 = vadd.f32 %v978_v26, %v1167_v25  ;;  %v290_v29 = vpop.f32.mrb[1].mxu0  ;;  %v395_v30 = vadd.f32 %v1002_v27, %v1167_v25  ;;  %v386_v31 = vpop.f32.mrb[1].mxu1 }
  0xdf   :  { %v291_v32 = vadd.f32 %v1167_v25, %v290_v29  ;;  %v979_v33 = vpop.f32.mrb[2].mxu0  ;;  %v387_v34 = vadd.f32 %v1167_v25, %v386_v31  ;;  %v1003_v35 = vpop.f32.mrb[2].mxu1 }
  0xe0   :  { %vm466_vm3 = vcmp.gt.f32.partialorder %v299_v28, 0.0  ;;  %v509_v36 = vmul.f32 0.01, %v299_v28  ;;  %v302_v37 = vadd.f32 %v979_v33, %v1167_v25  ;;  %v293_v38 = vpop.f32.mrb[3].mxu0  ;;  %vm490_vm4 = vcmp.gt.f32.partialorder %v395_v30, 0.0  ;;  %v389_v39 = vpop.f32.mrb[3].mxu1 }
  0xe1   :  { %vm464_vm5 = vcmp.gt.f32.partialorder %v291_v32, 0.0  ;;  %v507_v40 = vmul.f32 0.01, %v291_v32  ;;  %v294_v41 = vadd.f32 %v1167_v25, %v293_v38  ;;  %v533_v42 = vmul.f32 0.01, %v395_v30 }
  0xe2   :  { %v552_v43 = vsel %vm466_vm3, %v299_v28, %v509_v36  ;;  %vm467_vm6 = vcmp.gt.f32.partialorder %v302_v37, 0.0  ;;  %v510_v44 = vmul.f32 0.01, %v302_v37  ;;  %vm488_vm7 = vcmp.gt.f32.partialorder %v387_v34, 0.0 }
  0xe3   :  { %v907_v45 = vpack.c.bf16 %v552_v43, %v552_v43  ;;  %v550_v46 = vsel %vm464_vm5, %v291_v32, %v507_v40  ;;  %vm465_vm8 = vcmp.gt.f32.partialorder %v294_v41, 0.0  ;;  %v508_v47 = vmul.f32 0.01, %v294_v41 }
  0xe4   :  { %v905_v48 = vpack.c.bf16 %v550_v46, %v550_v46  ;;  %v553_v49 = vsel %vm467_vm6, %v302_v37, %v510_v44  ;;  %v576_v50 = vsel %vm490_vm4, %v395_v30, %v533_v42  ;;  %v531_v51 = vmul.f32 0.01, %v387_v34 }
  0xe5   :  { %769 = vst.msk [vmem:[%s1394_s3 + $0x8] sm:$0xf] %vm766_vm2, %v907_v45  ;;  %v908_v52 = vpack.c.bf16 %v553_v49, %v553_v49  ;;  %v551_v53 = vsel %vm465_vm8, %v294_v41, %v508_v47  ;;  %v931_v54 = vpack.c.bf16 %v576_v50, %v576_v50  ;;  %v398_v55 = vadd.f32 %v1003_v35, %v1167_v25  ;;  %v982_v56 = vpop.f32.mrb[4].mxu0  ;;  %v1006_v57 = vpop.f32.mrb[4].mxu1 }
  0xe6   :  { %767 = vst.msk [vmem:[%s1394_s3] sm:$0xf] %vm766_vm2, %v905_v48  ;;  %v906_v58 = vpack.c.bf16 %v551_v53, %v551_v53  ;;  %v574_v59 = vsel %vm488_vm7, %v387_v34, %v531_v51  ;;  %v390_v60 = vadd.f32 %v1167_v25, %v389_v39  ;;  %v315_v61 = vadd.f32 %v982_v56, %v1167_v25  ;;  %v306_v62 = vpop.f32.mrb[5].mxu0  ;;  %v402_v63 = vpop.f32.mrb[5].mxu1 }
  0xe7   :  { %770 = vst.msk [vmem:[%s1394_s3 + $0xc] sm:$0xf] %vm766_vm2, %v908_v52  ;;  %793 = vst.msk [vmem:[%s1394_s3 + $0x68] sm:$0xf] %vm766_vm2, %v931_v54  ;;  %v929_v0 = vpack.c.bf16 %v574_v59, %v574_v59  ;;  %vm491_vm9 = vcmp.gt.f32.partialorder %v398_v55, 0.0  ;;  %v307_v2 = vadd.f32 %v1167_v25, %v306_v62  ;;  %v983_v3 = vpop.f32.mrb[6].mxu0  ;;  %v411_v22 = vadd.f32 %v1006_v57, %v1167_v25 }
  0xe8   :  { %v534_v1 = vmul.f32 0.01, %v398_v55  ;;  %v1007_v4 = vpop.f32.mrb[6].mxu1  ;;  %768 = vst.msk [vmem:[%s1394_s3 + $0x4] sm:$0xf] %vm766_vm2, %v906_v58  ;;  %vm489_vm10 = vcmp.gt.f32.partialorder %v390_v60, 0.0  ;;  %v318_v9 = vadd.f32 %v983_v3, %v1167_v25  ;;  %v403_v23 = vadd.f32 %v1167_v25, %v402_v63 }
  0xe9   :  { %v532_v5 = vmul.f32 0.01, %v390_v60  ;;  %vm470_vm11 = vcmp.gt.f32.partialorder %v315_v61, 0.0  ;;  %v513_v6 = vmul.f32 0.01, %v315_v61  ;;  %vm468_vm12 = vcmp.gt.f32.partialorder %v307_v2, 0.0 }
  0xea   :  { %791 = vst.msk [vmem:[%s1394_s3 + $0x60] sm:$0xf] %vm766_vm2, %v929_v0  ;;  %v577_v7 = vsel %vm491_vm9, %v398_v55, %v534_v1  ;;  %v511_v8 = vmul.f32 0.01, %v307_v2  ;;  %v309_v10 = vpop.f32.mrb[7].mxu0  ;;  %v405_v11 = vpop.f32.mrb[7].mxu1  ;;  %v414_v24 = vadd.f32 %v1007_v4, %v1167_v25 }
  0xeb   :  { %v932_v12 = vpack.c.bf16 %v577_v7, %v577_v7  ;;  %v575_v13 = vsel %vm489_vm10, %v390_v60, %v532_v5  ;;  %v556_v14 = vsel %vm470_vm11, %v315_v61, %v513_v6  ;;  %v310_v15 = vadd.f32 %v1167_v25, %v309_v10 }
  0xec   :  { %v930_v16 = vpack.c.bf16 %v575_v13, %v575_v13  ;;  %v911_v17 = vpack.c.bf16 %v556_v14, %v556_v14  ;;  %v554_v18 = vsel %vm468_vm12, %v307_v2, %v511_v8  ;;  %vm471_vm13 = vcmp.gt.f32.partialorder %v318_v9, 0.0 }
  0xed   :  { %794 = vst.msk [vmem:[%s1394_s3 + $0x6c] sm:$0xf] %vm766_vm2, %v932_v12  ;;  %v909_v19 = vpack.c.bf16 %v554_v18, %v554_v18  ;;  %v514_v20 = vmul.f32 0.01, %v318_v9  ;;  %vm469_vm14 = vcmp.gt.f32.partialorder %v310_v15, 0.0  ;;  %v406_v26 = vadd.f32 %v1167_v25, %v405_v11  ;;  %v986_v27 = vpop.f32.mrb[8].mxu0 }
  0xee   :  { %v512_v21 = vmul.f32 0.01, %v310_v15  ;;  %792 = vst.msk [vmem:[%s1394_s3 + $0x64] sm:$0xf] %vm766_vm2, %v930_v16  ;;  %773 = vst.msk [vmem:[%s1394_s3 + $0x18] sm:$0xf] %vm766_vm2, %v911_v17  ;;  %v331_v31 = vadd.f32 %v986_v27, %v1167_v25 }
  0xef   :  { %v1010_v28 = vpop.f32.mrb[8].mxu1  ;;  %771 = vst.msk [vmem:[%s1394_s3 + $0x10] sm:$0xf] %vm766_vm2, %v909_v19  ;;  %v557_v29 = vsel %vm471_vm13, %v318_v9, %v514_v20  ;;  %v322_v32 = vpop.f32.mrb[9].mxu0  ;;  %vm494_vm15 = vcmp.gt.f32.partialorder %v411_v22, 0.0  ;;  %vm492_vm0 = vcmp.gt.f32.partialorder %v403_v23, 0.0 }
  0xf0   :  { %v555_v30 = vsel %vm469_vm14, %v310_v15, %v512_v21  ;;  %v427_v33 = vadd.f32 %v1010_v28, %v1167_v25  ;;  %v418_v34 = vpop.f32.mrb[9].mxu1  ;;  %v912_v35 = vpack.c.bf16 %v557_v29, %v557_v29  ;;  %v537_v37 = vmul.f32 0.01, %v411_v22  ;;  %v987_v38 = vpop.f32.mrb[10].mxu0 }
  0xf1   :  { %v910_v36 = vpack.c.bf16 %v555_v30, %v555_v30  ;;  %v1011_v39 = vpop.f32.mrb[10].mxu1  ;;  %v535_v40 = vmul.f32 0.01, %v403_v23  ;;  %vm495_vm1 = vcmp.gt.f32.partialorder %v414_v24, 0.0  ;;  %v538_v41 = vmul.f32 0.01, %v414_v24 }
  0xf2   :  { %774 = vst.msk [vmem:[%s1394_s3 + $0x1c] sm:$0xf] %vm766_vm2, %v912_v35  ;;  %v580_v42 = vsel %vm494_vm15, %v411_v22, %v537_v37  ;;  %vm493_vm3 = vcmp.gt.f32.partialorder %v406_v26, 0.0  ;;  %v536_v43 = vmul.f32 0.01, %v406_v26  ;;  %vm474_vm4 = vcmp.gt.f32.partialorder %v331_v31, 0.0 }
  0xf3   :  { %772 = vst.msk [vmem:[%s1394_s3 + $0x14] sm:$0xf] %vm766_vm2, %v910_v36  ;;  %v325_v44 = vpop.f32.mrb[11].mxu0  ;;  %v421_v45 = vpop.f32.mrb[11].mxu1  ;;  %v935_v46 = vpack.c.bf16 %v580_v42, %v580_v42  ;;  %v578_v47 = vsel %vm492_vm0, %v403_v23, %v535_v40  ;;  %v581_v48 = vsel %vm495_vm1, %v414_v24, %v538_v41  ;;  %v517_v49 = vmul.f32 0.01, %v331_v31 }
  0xf4   :  { %v933_v50 = vpack.c.bf16 %v578_v47, %v578_v47  ;;  %v936_v51 = vpack.c.bf16 %v581_v48, %v581_v48  ;;  %v579_v52 = vsel %vm493_vm3, %v406_v26, %v536_v43  ;;  %v323_v53 = vadd.f32 %v1167_v25, %v322_v32 }
  0xf5   :  { %797 = vst.msk [vmem:[%s1394_s3 + $0x78] sm:$0xf] %vm766_vm2, %v935_v46  ;;  %v934_v54 = vpack.c.bf16 %v579_v52, %v579_v52  ;;  %v560_v55 = vsel %vm474_vm4, %v331_v31, %v517_v49  ;;  %v334_v56 = vadd.f32 %v987_v38, %v1167_v25  ;;  %v326_v57 = vadd.f32 %v1167_v25, %v325_v44  ;;  %v990_v60 = vpop.f32.mrb[12].mxu0  ;;  %v1014_v61 = vpop.f32.mrb[12].mxu1 }
  0xf6   :  { %795 = vst.msk [vmem:[%s1394_s3 + $0x70] sm:$0xf] %vm766_vm2, %v933_v50  ;;  %798 = vst.msk [vmem:[%s1394_s3 + $0x7c] sm:$0xf] %vm766_vm2, %v936_v51  ;;  %v915_v58 = vpack.c.bf16 %v560_v55, %v560_v55  ;;  %vm472_vm5 = vcmp.gt.f32.partialorder %v323_v53, 0.0  ;;  %vm498_vm6 = vcmp.gt.f32.partialorder %v427_v33, 0.0  ;;  %v419_v2 = vadd.f32 %v1167_v25, %v418_v34 }
  0xf7   :  { %v515_v59 = vmul.f32 0.01, %v323_v53  ;;  %796 = vst.msk [vmem:[%s1394_s3 + $0x74] sm:$0xf] %vm766_vm2, %v934_v54  ;;  %vm475_vm7 = vcmp.gt.f32.partialorder %v334_v56, 0.0  ;;  %vm473_vm8 = vcmp.gt.f32.partialorder %v326_v57, 0.0  ;;  %v430_v3 = vadd.f32 %v1011_v39, %v1167_v25 }
  0xf8   :  { %v518_v62 = vmul.f32 0.01, %v334_v56  ;;  %v516_v63 = vmul.f32 0.01, %v326_v57  ;;  %777 = vst.msk [vmem:[%s1394_s3 + $0x28] sm:$0xf] %vm766_vm2, %v915_v58  ;;  %v422_v9 = vadd.f32 %v1167_v25, %v421_v45  ;;  %v347_v21 = vadd.f32 %v990_v60, %v1167_v25 }
  0xf9   :  { %v558_v0 = vsel %vm472_vm5, %v323_v53, %v515_v59  ;;  %v541_v1 = vmul.f32 0.01, %v427_v33  ;;  %v338_v4 = vpop.f32.mrb[13].mxu0  ;;  %v434_v5 = vpop.f32.mrb[13].mxu1  ;;  %vm496_vm9 = vcmp.gt.f32.partialorder %v419_v2, 0.0  ;;  %vm499_vm10 = vcmp.gt.f32.partialorder %v430_v3, 0.0 }
  0xfa   :  { %v913_v6 = vpack.c.bf16 %v558_v0, %v558_v0  ;;  %v561_v7 = vsel %vm475_vm7, %v334_v56, %v518_v62  ;;  %v559_v8 = vsel %vm473_vm8, %v326_v57, %v516_v63  ;;  %v991_v10 = vpop.f32.mrb[14].mxu0  ;;  %v1015_v11 = vpop.f32.mrb[14].mxu1  ;;  %v539_v18 = vmul.f32 0.01, %v419_v2 }
  0xfb   :  { %v916_v12 = vpack.c.bf16 %v561_v7, %v561_v7  ;;  %v914_v13 = vpack.c.bf16 %v559_v8, %v559_v8  ;;  %v584_v14 = vsel %vm498_vm6, %v427_v33, %v541_v1  ;;  %v341_v15 = vpop.f32.mrb[15].mxu0  ;;  %v437_v16 = vpop.f32.mrb[15].mxu1  ;;  %v542_v19 = vmul.f32 0.01, %v430_v3 }
  0xfc   :  { %775 = vst.msk [vmem:[%s1394_s3 + $0x20] sm:$0xf] %vm766_vm2, %v913_v6  ;;  %v939_v17 = vpack.c.bf16 %v584_v14, %v584_v14  ;;  %vm497_vm11 = vcmp.gt.f32.partialorder %v422_v9, 0.0  ;;  %v540_v20 = vmul.f32 0.01, %v422_v9  ;;  %v339_v22 = vadd.f32 %v1167_v25, %v338_v4 }
  0xfd   :  { %778 = vst.msk [vmem:[%s1394_s3 + $0x2c] sm:$0xf] %vm766_vm2, %v916_v12  ;;  %776 = vst.msk [vmem:[%s1394_s3 + $0x24] sm:$0xf] %vm766_vm2, %v914_v13  ;;  %v582_v23 = vsel %vm496_vm9, %v419_v2, %v539_v18  ;;  %v585_v24 = vsel %vm499_vm10, %v430_v3, %v542_v19  ;;  %v350_v26 = vadd.f32 %v991_v10, %v1167_v25  ;;  %vm478_vm12 = vcmp.gt.f32.partialorder %v347_v21, 0.0  ;;  %v994_v31 = vpop.f32.mrb[16].mxu0 }
  0xfe   :  { %801 = vst.msk [vmem:[%s1394_s3 + $0x88] sm:$0xf] %vm766_vm2, %v939_v17  ;;  %v342_v27 = vadd.f32 %v1167_v25, %v341_v15  ;;  %v937_v28 = vpack.c.bf16 %v582_v23, %v582_v23  ;;  %v940_v29 = vpack.c.bf16 %v585_v24, %v585_v24  ;;  %v583_v30 = vsel %vm497_vm11, %v422_v9, %v540_v20  ;;  %v1284_v32 = vpop.f32.mrb[16].mxu1  ;;  %v354_v36 = vpop.f32.mrb[17].mxu0 }
  0xff   :  { %v938_v33 = vpack.c.bf16 %v583_v30, %v583_v30  ;;  %v521_v34 = vmul.f32 0.01, %v347_v21  ;;  %vm476_vm13 = vcmp.gt.f32.partialorder %v339_v22, 0.0  ;;  %v519_v35 = vmul.f32 0.01, %v339_v22  ;;  %v995_v43 = vpop.f32.mrb[18].mxu0 }
 0x100   :  { %799 = vst.msk [vmem:[%s1394_s3 + $0x80] sm:$0xf] %vm766_vm2, %v937_v28  ;;  %802 = vst.msk [vmem:[%s1394_s3 + $0x8c] sm:$0xf] %vm766_vm2, %v940_v29  ;;  %vm479_vm14 = vcmp.gt.f32.partialorder %v350_v26, 0.0  ;;  %vm477_vm15 = vcmp.gt.f32.partialorder %v342_v27, 0.0  ;;  %v443_v41 = vadd.f32 %v1014_v61, %v1167_v25  ;;  %v435_v42 = vadd.f32 %v1167_v25, %v434_v5 }
 0x101   :  { %v522_v37 = vmul.f32 0.01, %v350_v26  ;;  %v520_v38 = vmul.f32 0.01, %v342_v27  ;;  %800 = vst.msk [vmem:[%s1394_s3 + $0x84] sm:$0xf] %vm766_vm2, %v938_v33  ;;  %v564_v39 = vsel %vm478_vm12, %v347_v21, %v521_v34  ;;  %v562_v40 = vsel %vm476_vm13, %v339_v22, %v519_v35 }
 0x102   :  { %v450_v44 = vpop.f32.mrb[17].mxu1  ;;  %v919_v45 = vpack.c.bf16 %v564_v39, %v564_v39  ;;  %v917_v46 = vpack.c.bf16 %v562_v40, %v562_v40  ;;  %v357_v49 = vpop.f32.mrb[19].mxu0  ;;  %vm502_vm0 = vcmp.gt.f32.partialorder %v443_v41, 0.0  ;;  %v545_v53 = vmul.f32 0.01, %v443_v41 }
 0x103   :  { %v565_v47 = vsel %vm479_vm14, %v350_v26, %v522_v37  ;;  %v563_v48 = vsel %vm477_vm15, %v342_v27, %v520_v38  ;;  %v1019_v50 = vpop.f32.mrb[18].mxu1  ;;  %vm500_vm1 = vcmp.gt.f32.partialorder %v435_v42, 0.0  ;;  %v543_v55 = vmul.f32 0.01, %v435_v42 }
 0x104   :  { %v920_v51 = vpack.c.bf16 %v565_v47, %v565_v47  ;;  %v918_v52 = vpack.c.bf16 %v563_v48, %v563_v48  ;;  %v453_v54 = vpop.f32.mrb[19].mxu1  ;;  %781 = vst.msk [vmem:[%s1394_s3 + $0x38] sm:$0xf] %vm766_vm2, %v919_v45  ;;  %779 = vst.msk [vmem:[%s1394_s3 + $0x30] sm:$0xf] %vm766_vm2, %v917_v46  ;;  %v446_v56 = vadd.f32 %v1015_v11, %v1167_v25  ;;  %vm809_vm6 = vcmask 516096  }
 0x105   :  { %v438_v57 = vadd.f32 %v1167_v25, %v437_v16  ;;  %v588_v58 = vsel %vm502_vm0, %v443_v41, %v545_v53  ;;  %v363_v59 = vadd.f32 %v994_v31, %v1167_v25  ;;  %v355_v60 = vadd.f32 %v1167_v25, %v354_v36  ;;  %v998_v1 = vpop.f32.mrb[20].mxu0 }
 0x106   :  { %782 = vst.msk [vmem:[%s1394_s3 + $0x3c] sm:$0xf] %vm766_vm2, %v920_v51  ;;  %780 = vst.msk [vmem:[%s1394_s3 + $0x34] sm:$0xf] %vm766_vm2, %v918_v52  ;;  %v366_v61 = vadd.f32 %v995_v43, %v1167_v25  ;;  %v943_v62 = vpack.c.bf16 %v588_v58, %v588_v58  ;;  %v586_v63 = vsel %vm500_vm1, %v435_v42, %v543_v55  ;;  %vm503_vm3 = vcmp.gt.f32.partialorder %v446_v56, 0.0  ;;  %v370_v4 = vpop.f32.mrb[21].mxu0 }
 0x107   :  { %v546_v0 = vmul.f32 0.01, %v446_v56  ;;  %v941_v2 = vpack.c.bf16 %v586_v63, %v586_v63  ;;  %vm501_vm4 = vcmp.gt.f32.partialorder %v438_v57, 0.0  ;;  %v544_v3 = vmul.f32 0.01, %v438_v57  ;;  %v999_v8 = vpop.f32.mrb[22].mxu0 }
 0x108   :  { %vm482_vm5 = vcmp.gt.f32.partialorder %v363_v59, 0.0  ;;  %805 = vst.msk [vmem:[%s1394_s3 + $0x98] sm:$0xf] %vm766_vm2, %v943_v62  ;;  %v525_v6 = vmul.f32 0.01, %v363_v59  ;;  %vm480_vm7 = vcmp.gt.f32.partialorder %v355_v60, 0.0  ;;  %v358_v16 = vadd.f32 %v1167_v25, %v357_v49 }
 0x109   :  { %v589_v5 = vsel %vm503_vm3, %v446_v56, %v546_v0  ;;  %v523_v7 = vmul.f32 0.01, %v355_v60  ;;  %803 = vst.msk [vmem:[%s1394_s3 + $0x90] sm:$0xf] %vm766_vm2, %v941_v2  ;;  %v587_v10 = vsel %vm501_vm4, %v438_v57, %v544_v3  ;;  %vm483_vm8 = vcmp.gt.f32.partialorder %v366_v61, 0.0  ;;  %v373_v12 = vpop.f32.mrb[23].mxu0 }
 0x10a   :  { %v944_v9 = vpack.c.bf16 %v589_v5, %v589_v5  ;;  %v526_v11 = vmul.f32 0.01, %v366_v61  ;;  %v942_v13 = vpack.c.bf16 %v587_v10, %v587_v10  ;;  %v568_v14 = vsel %vm482_vm5, %v363_v59, %v525_v6 }
 0x10b   :  { %v566_v15 = vsel %vm480_vm7, %v355_v60, %v523_v7  ;;  %v923_v17 = vpack.c.bf16 %v568_v14, %v568_v14  ;;  %v459_v20 = vadd.f32 %v1284_v32, %v1167_v25  ;;  %vm481_vm9 = vcmp.gt.f32.partialorder %v358_v16, 0.0 }
 0x10c   :  { %806 = vst.msk [vmem:[%s1394_s3 + $0x9c] sm:$0xf] %vm766_vm2, %v944_v9  ;;  %v921_v18 = vpack.c.bf16 %v566_v15, %v566_v15  ;;  %v569_v19 = vsel %vm483_vm8, %v366_v61, %v526_v11  ;;  %804 = vst.msk [vmem:[%s1394_s3 + $0x94] sm:$0xf] %vm766_vm2, %v942_v13  ;;  %v524_v22 = vmul.f32 0.01, %v358_v16  ;;  %v451_v23 = vadd.f32 %v1167_v25, %v450_v44 }
 0x10d   :  { %v924_v21 = vpack.c.bf16 %v569_v19, %v569_v19  ;;  %785 = vst.msk [vmem:[%s1394_s3 + $0x48] sm:$0xf] %vm766_vm2, %v923_v17  ;;  %vm506_vm10 = vcmp.gt.f32.partialorder %v459_v20, 0.0  ;;  %v549_v24 = vmul.f32 0.01, %v459_v20  ;;  %v454_v26 = vadd.f32 %v1167_v25, %v453_v54 }
 0x10e   :  { %783 = vst.msk [vmem:[%s1394_s3 + $0x40] sm:$0xf] %vm766_vm2, %v921_v18  ;;  %v379_v27 = vadd.f32 %v998_v1, %v1167_v25  ;;  %v567_v28 = vsel %vm481_vm9, %v358_v16, %v524_v22  ;;  %vm504_vm11 = vcmp.gt.f32.partialorder %v451_v23, 0.0  ;;  %v547_v29 = vmul.f32 0.01, %v451_v23 }
 0x10f   :  { %786 = vst.msk [vmem:[%s1394_s3 + $0x4c] sm:$0xf] %vm766_vm2, %v924_v21  ;;  %v371_v30 = vadd.f32 %v1167_v25, %v370_v4  ;;  %v922_v31 = vpack.c.bf16 %v567_v28, %v567_v28  ;;  %v592_v32 = vsel %vm506_vm10, %v459_v20, %v549_v24  ;;  %vm505_vm12 = vcmp.gt.f32.partialorder %v454_v26, 0.0 }
 0x110   :  { %v548_v33 = vmul.f32 0.01, %v454_v26  ;;  %v947_v34 = vpack.c.bf16 %v592_v32, %v592_v32  ;;  %v590_v35 = vsel %vm504_vm11, %v451_v23, %v547_v29  ;;  %vm486_vm13 = vcmp.gt.f32.partialorder %v379_v27, 0.0 }
 0x111   :  { %v529_v36 = vmul.f32 0.01, %v379_v27  ;;  %784 = vst.msk [vmem:[%s1394_s3 + $0x44] sm:$0xf] %vm766_vm2, %v922_v31  ;;  %v945_v37 = vpack.c.bf16 %v590_v35, %v590_v35  ;;  %vm484_vm14 = vcmp.gt.f32.partialorder %v371_v30, 0.0  ;;  %v382_v42 = vadd.f32 %v999_v8, %v1167_v25 }
 0x112   :  { %v591_v38 = vsel %vm505_vm12, %v454_v26, %v548_v33  ;;  %v527_v39 = vmul.f32 0.01, %v371_v30  ;;  %810 = vst.msk [vmem:[%s1394_s3 + $0xa8] sm:$0x1] %vm809_vm6, %v947_v34  ;;  %v374_v43 = vadd.f32 %v1167_v25, %v373_v12 }
 0x113   :  { %v946_v40 = vpack.c.bf16 %v591_v38, %v591_v38  ;;  %v572_v41 = vsel %vm486_vm13, %v379_v27, %v529_v36  ;;  %807 = vst.msk [vmem:[%s1394_s3 + $0xa0] sm:$0xf] %vm766_vm2, %v945_v37  ;;  %vm487_vm15 = vcmp.gt.f32.partialorder %v382_v42, 0.0  ;;  %v530_v47 = vmul.f32 0.01, %v382_v42 }
 0x114   :  { %v927_v44 = vpack.c.bf16 %v572_v41, %v572_v41  ;;  %v570_v45 = vsel %vm484_vm14, %v371_v30, %v527_v39  ;;  %vm485_vm0 = vcmp.gt.f32.partialorder %v374_v43, 0.0  ;;  %v528_v25 = vmul.f32 0.01, %v374_v43 }
 0x115   :  { %808 = vst.msk [vmem:[%s1394_s3 + $0xa4] sm:$0xf] %vm766_vm2, %v946_v40  ;;  %v925_v46 = vpack.c.bf16 %v570_v45, %v570_v45  ;;  %v573_v48 = vsel %vm487_vm15, %v382_v42, %v530_v47 }
 0x116   :  { %789 = vst.msk [vmem:[%s1394_s3 + $0x58] sm:$0xf] %vm766_vm2, %v927_v44  ;;  %v928_v49 = vpack.c.bf16 %v573_v48, %v573_v48  ;;  %v571_v50 = vsel %vm485_vm0, %v374_v43, %v528_v25 }
 0x117   :  { %787 = vst.msk [vmem:[%s1394_s3 + $0x50] sm:$0xf] %vm766_vm2, %v925_v46  ;;  %v926_v51 = vpack.c.bf16 %v571_v50, %v571_v50 }
 0x118   :  { %790 = vst.msk [vmem:[%s1394_s3 + $0x5c] sm:$0xf] %vm766_vm2, %v928_v49 }
 0x119   :  { %788 = vst.msk [vmem:[%s1394_s3 + $0x54] sm:$0xf] %vm766_vm2, %v926_v51 }

// kernel: discriminator_forward.7
= control target key start
LH: loop header
LB: loop body
LE: loop exit
PB: predicated region body
PF: predicated region fallthrough
CT: control target
= control target key end

     0   :  { %vm29_vm0 = vcmask 1041408   ;;  %v65_v22 = vlaneseq  ;;  %vm59_vm1 = vcmask 1040384   ;;  %vm93_vm2 = vcmask 1024   ;;  %s174_s1 = inlined_call_operand.vmem [shape: f32[2,128], index: 1, kind: input, shape index: {}]   ;;  %s175_s2 = inlined_call_operand.vmem [shape: f32[2,128], index: 2, kind: input, shape index: {}]   ;;  %s176_s3 = inlined_call_operand.vmem [shape: f32[1,128], index: 3, kind: input, shape index: {}]   ;;  %s177_s4 = inlined_call_operand.vmem [shape: f32[1,128], index: 4, kind: input, shape index: {}]   ;;  %s178_s5 = inlined_call_operand.vmem [shape: f32[1,128], index: 5, kind: input, shape index: {}]   ;;  %s179_s0 = inlined_call_operand.vmem [shape: f32[2,128], index: 0, kind: input, shape index: {}]   ;;  %s180_s6 = inlined_call_operand.<no memory space> [shape: f32[1,1], index: 6, kind: input, shape index: {}]   ;;  %s181_s7 = inlined_call_operand.vmem [shape: f32[2,1], index: 7, kind: output, shape index: {}]  }
   0x1   :  { %v28_v0 = vld [vmem:[%s174_s1] sm:$0x3]  ;;  %v12_v38 = vstv %s180_s6 }
   0x2   :  { %v38_v1 = vld [vmem:[%s175_s2] sm:$0x3]  ;;  %v30_v2 = vsel %vm29_vm0, %v28_v0, 0.0  ;;  %v66_v23 = vshrl.u32 %v65_v22, 7  ;;  %13 = vst [vmem:[#allocation2] sm:$0x1] %v12_v38 }
   0x3   :  { %v39_v3 = vsel %vm29_vm0, %v38_v1, 0.0  ;;  %v31_v4 = vrot.slane %v30_v2, 4  ;;  %v50_v24 = vld [vmem:[%s176_s3] sm:$0x1] }
   0x4   :  { %v40_v5 = vrot.slane %v39_v3, 4  ;;  %v67_v25 = vsub.s32 0, %v66_v23  ;;  %v54_v28 = vld [vmem:[%s177_s4] sm:$0x1] }
   0x5   :  { %v32_v6 = vadd.f32 %v31_v4, %v30_v2  ;;  %v57_v31 = vld [vmem:[%s178_s5] sm:$0x1] }
   0x6   :  { %v41_v7 = vadd.f32 %v40_v5, %v39_v3  ;;  %v63_v32 = vld [vmem:[%s179_s0] sm:$0x3] }
   0x7   :  { %v33_v8 = vrot.slane %v32_v6, 2 }
   0x8   :  { %v42_v9 = vrot.slane %v41_v7, 2 }
   0x9   :  { %v34_v10 = vadd.f32 %v33_v8, %v32_v6  ;;  %v99_v41 = vld [vmem:[#allocation2] ss:$0 sm:$0xff] }
   0xa   :  { %v43_v11 = vadd.f32 %v42_v9, %v41_v7 }
   0xb   :  { %v35_v12 = vrot.slane %v34_v10, 1 }
   0xc   :  { %v44_v13 = vrot.slane %v43_v11, 1 }
   0xd   :  { %v36_v14 = vadd.f32 %v35_v12, %v34_v10 }
   0xe   :  { %v45_v15 = vadd.f32 %v44_v13, %v43_v11 }
   0xf   :  { %v37_v16 = vmul.f32 0.013888889, %v36_v14 }
  0x10   :  { %v46_v17 = vmul.f32 0.013888889, %v45_v15 }
  0x11   :  { %v47_v18 = vmul.f32 %v37_v16, %v37_v16 }
  0x13   :  { %v48_v19 = vsub.f32 %v46_v17, %v47_v18 }
  0x15   :  { %v49_v20 = vmax.f32 %v48_v19, 0.0 }
  0x17   :  { %v51_v21 = vadd.f32 1e-05, %v49_v20 }
  0x19   :  { %101 = vrsqrt.f32 %v51_v21 }
  0x23   :  { %v102_v26 = vpop.eup %101 }
  0x24   :  { %v53_v27 = vmul.f32 %v102_v26, %v50_v24 }
  0x26   :  { %v55_v29 = vmul.f32 %v53_v27, %v37_v16  ;;  %v68_v30 = vrot.slane %v53_v27, %v67_v25 }
  0x28   :  { %v56_v33 = vsub.f32 %v54_v28, %v55_v29  ;;  %v70_v35 = vmul.f32 %v68_v30, %v63_v32 }
  0x2a   :  { %v58_v34 = vmul.f32 %v57_v31, %v56_v33  ;;  %v71_v37 = vsel %vm29_vm0, %v70_v35, 0.0 }
  0x2c   :  { %v60_v36 = vsel %vm59_vm1, %v58_v34, 0.0 }
  0x2d   :  { %61 = vadd.xlane.f32.xlu0 %v60_v36 }
  0x31   :  { %72 = vadd.xlane.f32.xlu0 %v71_v37 }
  0xba   :  { %v62_v39 = vpop.xlane.xlu0 %61 }
  0xbb   :  { %v77_v40 = vrot.slane %v62_v39, %v67_v25 }
  0xbe   :  { %v73_v42 = vpop.xlane.xlu0 %72 }
  0xbf   :  { %v78_v43 = vadd.f32 %v77_v40, %v73_v42 }
  0xc1   :  { %v86_v44 = vadd.f32 %v99_v41, %v78_v43 }
  0xc3   :  { %v100_v45 = vmul.f32 -1.442695, %v86_v44 }
  0xc5   :  { %103 = vpow2.f32 %v100_v45 }
  0xcf   :  { %v104_v46 = vpop.eup %103 }
  0xd0   :  { %v90_v47 = vadd.f32 1.0, %v104_v46 }
  0xd2   :  { %105 = vrcp.f32 %v90_v47 }
  0xdc   :  { %v106_v48 = vpop.eup %105 }
  0xdd   :  { %94 = vst.msk [vmem:[%s181_s7] sm:$0x3] %vm93_vm2, %v106_v48 }

// kernel: discriminator_forward.6
= control target key start
LH: loop header
LB: loop body
LE: loop exit
PB: predicated region body
PF: predicated region fallthrough
CT: control target
= control target key end

     0   :  { %v1144_v34 = vmov 0.0   ;;  %vm1145_vm0 = vmmov 0   ;;  %vm474_vm1 = vcmask 523264   ;;  %vm791_vm12 = vcmask 1041409   ;;  %s1467_s1 = inlined_call_operand.vmem [shape: bf16[576,128], index: 1, kind: input, shape index: {}]   ;;  %s1468_s0 = inlined_call_operand.vmem [shape: bf16[80,576], index: 0, kind: input, shape index: {}]   ;;  %s1469_s2 = inlined_call_operand.vmem [shape: f32[1,128], index: 2, kind: input, shape index: {}]   ;;  %s1470_s4 = inlined_call_operand.vmem [shape: f32[40,128], index: 4, kind: input, shape index: {}]   ;;  %s1471_s3 = inlined_call_operand.vmem [shape: f32[40,128], index: 3, kind: input, shape index: {}]   ;;  %s1472_s6 = inlined_call_operand.vmem [shape: f32[2,128], index: 6, kind: output, shape index: {1}]   ;;  %s1473_s5 = inlined_call_operand.vmem [shape: f32[2,128], index: 5, kind: output, shape index: {0}]   ;;  %s1474_s7 = inlined_call_operand.vmem [shape: f32[2,128], index: 7, kind: output, shape index: {2}]  }
   0x1   :  { %v1073_v0 = vld [vmem:[%s1467_s1 + $0x40] sm:$0xff]   ;;  %v1077_v4 = vld [vmem:[%s1467_s1 + $0x48] sm:$0xff]   ;;  %v1081_v8 = vld [vmem:[%s1467_s1 + $0x50] sm:$0xff]  }
   0x2   :  { %v1074_v1 = vld [vmem:[%s1467_s1 + $0xc0] sm:$0xff]   ;;  %934 = vmatprep.subr.bf16.mxu0 %v1073_v0  ;;  %v1078_v5 = vld [vmem:[%s1467_s1 + $0xc8] sm:$0xff]   ;;  %v1082_v9 = vld [vmem:[%s1467_s1 + $0xd0] sm:$0xff]  }
   0x3   :  { %v1075_v2 = vld [vmem:[%s1467_s1] sm:$0xff]   ;;  %980 = vmatprep.subr.bf16.mxu1 %v1074_v1  ;;  %v1079_v6 = vld [vmem:[%s1467_s1 + $0x8] sm:$0xff]   ;;  %v1083_v10 = vld [vmem:[%s1467_s1 + $0x10] sm:$0xff]  }
   0x4   :  { %v1076_v3 = vld [vmem:[%s1467_s1 + $0x80] sm:$0xff]   ;;  %935 = vmatpush3.bf16.msra.mxu0 %v1075_v2  ;;  %v1080_v7 = vld [vmem:[%s1467_s1 + $0x88] sm:$0xff]   ;;  %v1084_v11 = vld [vmem:[%s1467_s1 + $0x90] sm:$0xff]  }
   0x5   :  { %981 = vmatpush3.bf16.msra.mxu1 %v1076_v3  ;;  %936 = vmatprep.subr.bf16.mxu0 %v1077_v4  ;;  %v1085_v12 = vld [vmem:[%s1467_s1 + $0x58] sm:$0xff]   ;;  %v1089_v16 = vld [vmem:[%s1467_s1 + $0x60] sm:$0xff]   ;;  %v1093_v20 = vld [vmem:[%s1467_s1 + $0x68] sm:$0xff]  }
   0x6   :  { %982 = vmatprep.subr.bf16.mxu1 %v1078_v5  ;;  %v1086_v13 = vld [vmem:[%s1467_s1 + $0xd8] sm:$0xff]   ;;  %v1090_v17 = vld [vmem:[%s1467_s1 + $0xe0] sm:$0xff]   ;;  %v1094_v21 = vld [vmem:[%s1467_s1 + $0xe8] sm:$0xff]  }
   0x7   :  { %v1087_v14 = vld [vmem:[%s1467_s1 + $0x18] sm:$0xff]   ;;  %v1091_v18 = vld [vmem:[%s1467_s1 + $0x20] sm:$0xff]   ;;  %v1095_v22 = vld [vmem:[%s1467_s1 + $0x28] sm:$0xff]  }
   0x8   :  { %937 = vmatpush3.bf16.msra.mxu0 %v1079_v6  ;;  %v1088_v15 = vld [vmem:[%s1467_s1 + $0x98] sm:$0xff]   ;;  %v1092_v19 = vld [vmem:[%s1467_s1 + $0xa0] sm:$0xff]   ;;  %v1096_v23 = vld [vmem:[%s1467_s1 + $0xa8] sm:$0xff]  }
   0x9   :  { %983 = vmatpush3.bf16.msra.mxu1 %v1080_v7  ;;  %938 = vmatprep.subr.bf16.mxu0 %v1081_v8  ;;  %v1097_v24 = vld [vmem:[%s1467_s1 + $0x70] sm:$0xff]   ;;  %v1101_v28 = vld [vmem:[%s1467_s1 + $0x78] sm:$0xff]   ;;  %v1110_v36 = vld [vmem:[%s1468_s0 + $0xc] ss:$20 sps:$4 sm:$0xff]  }
   0xa   :  { %984 = vmatprep.subr.bf16.mxu1 %v1082_v9  ;;  %v1098_v25 = vld [vmem:[%s1467_s1 + $0xf0] sm:$0xff]   ;;  %v1102_v29 = vld [vmem:[%s1467_s1 + $0xf8] sm:$0xff]   ;;  %v1111_v37 = vld [vmem:[%s1467_s1 + $0x100] sm:$0xff]   ;;  %595 = vmatprep.mubr.bf16.mxu1 %v1110_v36 }
   0xb   :  { %v1099_v26 = vld [vmem:[%s1467_s1 + $0x30] sm:$0xff]   ;;  %v1103_v30 = vld [vmem:[%s1467_s1 + $0x38] sm:$0xff]   ;;  %v1112_v38 = vld [vmem:[%s1468_s0 + $0x2c] ss:$20 sps:$4 sm:$0xff]  }
   0xc   :  { %939 = vmatpush3.bf16.msra.mxu0 %v1083_v10  ;;  %v1100_v27 = vld [vmem:[%s1467_s1 + $0xb0] sm:$0xff]   ;;  %v1104_v31 = vld [vmem:[%s1467_s1 + $0xb8] sm:$0xff]   ;;  %v1118_v40 = vld [vmem:[%s1467_s1 + $0x108] sm:$0xff]  }
   0xd   :  { %985 = vmatpush3.bf16.msra.mxu1 %v1084_v11  ;;  %940 = vmatprep.subr.bf16.mxu0 %v1085_v12  ;;  %v1105_v32 = vld [vmem:[%s1468_s0] ss:$20 sps:$4 sm:$0xff]   ;;  %v1107_v33 = vld [vmem:[%s1468_s0 + $0x4] ss:$20 sps:$4 sm:$0xff]   ;;  %v1108_v35 = vld [vmem:[%s1468_s0 + $0x8] ss:$20 sps:$4 sm:$0xff]  }
   0xe   :  { %986 = vmatprep.subr.bf16.mxu1 %v1086_v13  ;;  %522 = vmatprep.mubr.bf16.mxu0 %v1107_v33  ;;  %v1114_v39 = vld [vmem:[%s1468_s0 + $0x34] ss:$20 sps:$4 sm:$0xff]   ;;  %v1117_v42 = vld [vmem:[%s1468_s0 + $0x30] ss:$20 sps:$4 sm:$0xff]   ;;  %v1124_v47 = vld [vmem:[%s1468_s0 + $0x58] ss:$20 sps:$4 sm:$0xff]  }
   0xf   :  { %v1116_v41 = vld [vmem:[%s1468_s0 + $0x28] ss:$20 sps:$4 sm:$0xff]   ;;  %v1125_v45 = vld [vmem:[%s1467_s1 + $0x110] sm:$0xff]   ;;  %v1128_v50 = vld [vmem:[%s1468_s0 + $0x84] ss:$20 sps:$4 sm:$0xff]  }
  0x10   :  { %941 = vmatpush3.bf16.msra.mxu0 %v1087_v14  ;;  %v1119_v43 = vld [vmem:[%s1468_s0 + $0x54] ss:$20 sps:$4 sm:$0xff]   ;;  %v1121_v44 = vld [vmem:[%s1468_s0 + $0x5c] ss:$20 sps:$4 sm:$0xff]   ;;  %v1130_v51 = vld [vmem:[%s1468_s0 + $0x78] ss:$20 sps:$4 sm:$0xff]  }
  0x11   :  { %987 = vmatpush3.bf16.msra.mxu1 %v1088_v15  ;;  %942 = vmatprep.subr.bf16.mxu0 %v1089_v16  ;;  %v1123_v46 = vld [vmem:[%s1468_s0 + $0x50] ss:$20 sps:$4 sm:$0xff]   ;;  %v1136_v48 = vld [vmem:[%s1467_s1 + $0x118] sm:$0xff]   ;;  %v1131_v52 = vld [vmem:[%s1468_s0 + $0x80] ss:$20 sps:$4 sm:$0xff]  }
  0x12   :  { %988 = vmatprep.subr.bf16.mxu1 %v1090_v17  ;;  %v1126_v49 = vld [vmem:[%s1468_s0 + $0x7c] ss:$20 sps:$4 sm:$0xff]   ;;  %v1132_v53 = vld [vmem:[%s1468_s0 + $0xa4] ss:$20 sps:$4 sm:$0xff]   ;;  %v1134_v54 = vld [vmem:[%s1468_s0 + $0xac] ss:$20 sps:$4 sm:$0xff]  }
  0x13   :  { %v1137_v55 = vld [vmem:[%s1468_s0 + $0xa0] ss:$20 sps:$4 sm:$0xff]   ;;  %v1138_v56 = vld [vmem:[%s1468_s0 + $0xa8] ss:$20 sps:$4 sm:$0xff]   ;;  %v1139_v57 = vld [vmem:[%s1468_s0 + $0x10] ss:$20 sps:$4 sm:$0xff]  }
  0x14   :  { %943 = vmatpush3.bf16.msra.mxu0 %v1091_v18  ;;  %v1140_v58 = vld [vmem:[%s1468_s0 + $0x88] ss:$20 sps:$4 sm:$0xff]   ;;  %v1141_v59 = vld [vmem:[%s1468_s0 + $0x38] ss:$20 sps:$4 sm:$0xff]   ;;  %v1142_v60 = vld [vmem:[%s1468_s0 + $0xb0] ss:$20 sps:$4 sm:$0xff]  }
  0x15   :  { %989 = vmatpush3.bf16.msra.mxu1 %v1092_v19  ;;  %944 = vmatprep.subr.bf16.mxu0 %v1093_v20  ;;  %v1143_v61 = vld [vmem:[%s1468_s0 + $0x60] ss:$20 sps:$4 sm:$0xff]  }
  0x16   :  { %990 = vmatprep.subr.bf16.mxu1 %v1094_v21  ;;  %v1385_v63 = vld [vmem:[%s1469_s2] ss:$0 sm:$0xff] }
  0x18   :  { %945 = vmatpush3.bf16.msra.mxu0 %v1095_v22 }
  0x19   :  { %991 = vmatpush3.bf16.msra.mxu1 %v1096_v23  ;;  %946 = vmatprep.subr.bf16.mxu0 %v1097_v24 }
  0x1a   :  { %992 = vmatprep.subr.bf16.mxu1 %v1098_v25 }
  0x1c   :  { %947 = vmatpush3.bf16.msra.mxu0 %v1099_v26 }
  0x1d   :  { %993 = vmatpush3.bf16.msra.mxu1 %v1100_v27  ;;  %948 = vmatprep.subr.bf16.mxu0 %v1101_v28 }
  0x1e   :  { %994 = vmatprep.subr.bf16.mxu1 %v1102_v29 }
  0x20   :  { %949 = vmatpush3.bf16.msra.mxu0 %v1103_v30 }
  0x21   :  { %995 = vmatpush3.bf16.msra.mxu1 %v1104_v31  ;;  %1035 = vmatprep.subr.bf16.mxu0 %v1144_v34 }
  0x22   :  { %1063 = vmatprep.subr.bf16.mxu1 %v1144_v34 }
  0x23   :  { %523 = vmatmul.mubr.bf16.vlgmr.msra.gmra.mrb[0].mxu0 %v1105_v32 }
  0x24   :  { %596 = vmatmul.mubr.bf16.vlgmr.msra.gmra.mrb[0].mxu1 %v1108_v35  ;;  %1036 = vmatpush3.bf16.msra.mxu0 %v1111_v37 }
  0x25   :  { %530 = vmatprep.mubr.bf16.mxu0 %v1112_v38  ;;  %1037 = vmatprep.subr.bf16.mxu0 %v1144_v34 }
  0x26   :  { %603 = vmatprep.mubr.bf16.mxu1 %v1114_v39  ;;  %1067 = vmatpush3.bf16.msra.mxu1 %v1111_v37 }
  0x27   :  { %1064 = vmatprep.subr.bf16.mxu1 %v1144_v34 }
  0x28   :  { %1038 = vmatpush3.bf16.msra.mxu0 %v1118_v40 }
  0x29   :  { %1039 = vmatprep.subr.bf16.mxu0 %v1144_v34 }
  0x2a   :  { %1068 = vmatpush3.bf16.msra.mxu1 %v1118_v40 }
  0x2b   :  { %531 = vmatmul.mubr.bf16.gmra.mrb[4].mxu0 %v1116_v41  ;;  %1065 = vmatprep.subr.bf16.mxu1 %v1144_v34 }
  0x2c   :  { %604 = vmatmul.mubr.bf16.gmra.mrb[4].mxu1 %v1117_v42  ;;  %538 = vmatprep.mubr.bf16.mxu0 %v1119_v43 }
  0x2d   :  { %611 = vmatprep.mubr.bf16.mxu1 %v1121_v44  ;;  %1040 = vmatpush3.bf16.msra.mxu0 %v1125_v45 }
  0x2e   :  { %1041 = vmatprep.subr.bf16.mxu0 %v1144_v34  ;;  %1069 = vmatpush3.bf16.msra.mxu1 %v1125_v45 }
  0x2f   :  { %1066 = vmatprep.subr.bf16.mxu1 %v1144_v34 }
  0x31   :  { %1042 = vmatpush3.bf16.msra.mxu0 %v1136_v48 }
  0x32   :  { %1070 = vmatpush3.bf16.msra.mxu1 %v1136_v48 }
  0x33   :  { %539 = vmatmul.mubr.bf16.gmra.mrb[8].mxu0 %v1123_v46 }
  0x34   :  { %612 = vmatmul.mubr.bf16.gmra.mrb[8].mxu1 %v1124_v47  ;;  %546 = vmatprep.mubr.bf16.mxu0 %v1126_v49 }
  0x35   :  { %619 = vmatprep.mubr.bf16.mxu1 %v1128_v50 }
  0x3b   :  { %547 = vmatmul.mubr.bf16.gmra.mrb[12].mxu0 %v1130_v51 }
  0x3c   :  { %620 = vmatmul.mubr.bf16.gmra.mrb[12].mxu1 %v1131_v52  ;;  %554 = vmatprep.mubr.bf16.mxu0 %v1132_v53 }
  0x3d   :  { %627 = vmatprep.mubr.bf16.mxu1 %v1134_v54 }
  0x43   :  { %555 = vmatmul.mubr.bf16.gmra.mrb[16].mxu0 %v1137_v55 }
  0x44   :  { %628 = vmatmul.mubr.bf16.gmra.mrb[16].mxu1 %v1138_v56  ;;  %1043 = vmatprep.mubr.msk.bf16.mxu0 %vm1145_vm0, %v1144_v34 }
  0x45   :  { %1055 = vmatprep.mubr.msk.bf16.mxu1 %vm1145_vm0, %v1144_v34 }
  0x4b   :  { %1044 = vmatmul.mubr.msk.bf16.vlgmr.msra.gmra.mrb[20].mxu0 %vm474_vm1, %v1139_v57 }
  0x4c   :  { %1056 = vmatmul.mubr.msk.bf16.vlgmr.msra.gmra.mrb[20].mxu1 %vm474_vm1, %v1140_v58  ;;  %1047 = vmatprep.mubr.msk.bf16.mxu0 %vm1145_vm0, %v1144_v34 }
  0x4d   :  { %1059 = vmatprep.mubr.msk.bf16.mxu1 %vm1145_vm0, %v1144_v34 }
  0x53   :  { %1048 = vmatmul.mubr.msk.bf16.gmra.mrb[24].mxu0 %vm474_vm1, %v1141_v59 }
  0x54   :  { %1060 = vmatmul.mubr.msk.bf16.gmra.mrb[24].mxu1 %vm474_vm1, %v1142_v60  ;;  %1051 = vmatprep.mubr.msk.bf16.mxu0 %vm1145_vm0, %v1144_v34 }
  0x5b   :  { %1052 = vmatmul.mubr.msk.bf16.gmra.mrb[28].mxu0 %vm474_vm1, %v1143_v61 }
  0xf6   :  { %v950_v62 = vpop.f32.mrb[0].mxu0 }
  0xf7   :  { %v951_v0 = vpop.f32.mrb[1].mxu0  ;;  %v996_v1 = vpop.f32.mrb[0].mxu1 }
  0xf8   :  { %v952_v2 = vadd.f32 %v951_v0, %v950_v62  ;;  %v953_v3 = vpop.f32.mrb[2].mxu0  ;;  %v997_v4 = vpop.f32.mrb[1].mxu1 }
  0xf9   :  { %v954_v5 = vpop.f32.mrb[3].mxu0  ;;  %v998_v6 = vadd.f32 %v997_v4, %v996_v1  ;;  %v999_v7 = vpop.f32.mrb[2].mxu1 }
  0xfa   :  { %v525_v8 = vadd.f32 %v952_v2, %v1385_v63  ;;  %v955_v9 = vadd.f32 %v954_v5, %v953_v3  ;;  %v1000_v10 = vpop.f32.mrb[3].mxu1 }
  0xfb   :  { %v1001_v11 = vadd.f32 %v1000_v10, %v999_v7 }
  0xfc   :  { %v528_v12 = vadd.f32 %v955_v9, %v1385_v63  ;;  %v1389_v13 = vadd.f32 %v998_v6, %v525_v8 }
  0xfe   :  { %v956_v14 = vpop.f32.mrb[4].mxu0  ;;  %v1391_v15 = vadd.f32 %v1001_v11, %v528_v12 }
  0xff   :  { %v957_v16 = vpop.f32.mrb[5].mxu0  ;;  %v1002_v17 = vpop.f32.mrb[4].mxu1 }
 0x100   :  { %v958_v18 = vadd.f32 %v957_v16, %v956_v14  ;;  %v959_v19 = vpop.f32.mrb[6].mxu0  ;;  %v1003_v20 = vpop.f32.mrb[5].mxu1 }
 0x101   :  { %v960_v21 = vpop.f32.mrb[7].mxu0  ;;  %v1004_v22 = vadd.f32 %v1003_v20, %v1002_v17  ;;  %v1005_v23 = vpop.f32.mrb[6].mxu1 }
 0x102   :  { %v533_v24 = vadd.f32 %v958_v18, %v1385_v63  ;;  %v961_v25 = vadd.f32 %v960_v21, %v959_v19  ;;  %v1006_v26 = vpop.f32.mrb[7].mxu1 }
 0x103   :  { %v1007_v27 = vadd.f32 %v1006_v26, %v1005_v23  ;;  %v1413_v26 = vld [vmem:[%s1470_s4] sm:$0xff] }
 0x104   :  { %v536_v28 = vadd.f32 %v961_v25, %v1385_v63  ;;  %v1395_v29 = vadd.f32 %v1004_v22, %v533_v24 }
 0x106   :  { %v962_v30 = vpop.f32.mrb[8].mxu0  ;;  %v1397_v31 = vadd.f32 %v1007_v27, %v536_v28 }
 0x107   :  { %v963_v32 = vpop.f32.mrb[9].mxu0  ;;  %v1008_v33 = vpop.f32.mrb[8].mxu1 }
 0x108   :  { %v964_v34 = vadd.f32 %v963_v32, %v962_v30  ;;  %v965_v35 = vpop.f32.mrb[10].mxu0  ;;  %v1009_v36 = vpop.f32.mrb[9].mxu1 }
 0x109   :  { %v966_v37 = vpop.f32.mrb[11].mxu0  ;;  %v1010_v38 = vadd.f32 %v1009_v36, %v1008_v33  ;;  %v1011_v39 = vpop.f32.mrb[10].mxu1  ;;  %v740_v36 = vld [vmem:[%s1470_s4 + $0x8] sm:$0xff] }
 0x10a   :  { %v541_v40 = vadd.f32 %v964_v34, %v1385_v63  ;;  %v967_v41 = vadd.f32 %v966_v37, %v965_v35  ;;  %v1012_v42 = vpop.f32.mrb[11].mxu1  ;;  %v1420_v35 = vld [vmem:[%s1471_s3] sm:$0xff] }
 0x10b   :  { %v1013_v43 = vadd.f32 %v1012_v42, %v1011_v39  ;;  %v1429_v42 = vld [vmem:[%s1471_s3 + $0x8] sm:$0xff] }
 0x10c   :  { %v544_v44 = vadd.f32 %v967_v41, %v1385_v63  ;;  %v1401_v45 = vadd.f32 %v1010_v38, %v541_v40 }
 0x10e   :  { %v968_v46 = vpop.f32.mrb[12].mxu0  ;;  %v1403_v47 = vadd.f32 %v1013_v43, %v544_v44 }
 0x10f   :  { %v969_v48 = vpop.f32.mrb[13].mxu0  ;;  %v1014_v49 = vpop.f32.mrb[12].mxu1 }
 0x110   :  { %v970_v50 = vadd.f32 %v969_v48, %v968_v46  ;;  %v971_v51 = vpop.f32.mrb[14].mxu0  ;;  %v1015_v52 = vpop.f32.mrb[13].mxu1 }
 0x111   :  { %v972_v53 = vpop.f32.mrb[15].mxu0  ;;  %v1016_v54 = vadd.f32 %v1015_v52, %v1014_v49  ;;  %v1017_v55 = vpop.f32.mrb[14].mxu1 }
 0x112   :  { %v549_v56 = vadd.f32 %v970_v50, %v1385_v63  ;;  %v973_v57 = vadd.f32 %v972_v53, %v971_v51  ;;  %v1018_v58 = vpop.f32.mrb[15].mxu1 }
 0x113   :  { %v1019_v59 = vadd.f32 %v1018_v58, %v1017_v55 }
 0x114   :  { %v552_v60 = vadd.f32 %v973_v57, %v1385_v63  ;;  %v622_v61 = vadd.f32 %v1016_v54, %v549_v56 }
 0x116   :  { %v974_v62 = vpop.f32.mrb[16].mxu0  ;;  %v625_v0 = vadd.f32 %v1019_v59, %v552_v60 }
 0x117   :  { %v975_v1 = vpop.f32.mrb[17].mxu0  ;;  %v1020_v2 = vpop.f32.mrb[16].mxu1 }
 0x118   :  { %v976_v3 = vadd.f32 %v975_v1, %v974_v62  ;;  %v977_v4 = vpop.f32.mrb[18].mxu0  ;;  %v1021_v5 = vpop.f32.mrb[17].mxu1 }
 0x119   :  { %v978_v6 = vpop.f32.mrb[19].mxu0  ;;  %v1022_v7 = vadd.f32 %v1021_v5, %v1020_v2  ;;  %v1023_v8 = vpop.f32.mrb[18].mxu1 }
 0x11a   :  { %v557_v9 = vadd.f32 %v976_v3, %v1385_v63  ;;  %v979_v10 = vadd.f32 %v978_v6, %v977_v4  ;;  %v1024_v11 = vpop.f32.mrb[19].mxu1  ;;  %v756_v3 = vld [vmem:[%s1471_s3 + $0x10] sm:$0xff] }
 0x11b   :  { %v1025_v12 = vadd.f32 %v1024_v11, %v1023_v8 }
 0x11c   :  { %v560_v14 = vadd.f32 %v979_v10, %v1385_v63  ;;  %v630_v16 = vadd.f32 %v1022_v7, %v557_v9 }
 0x11e   :  { %v670_v17 = vpop.f32.mrb[20].mxu0  ;;  %v633_v18 = vadd.f32 %v1025_v12, %v560_v14 }
 0x11f   :  { %v671_v19 = vadd.f32 %v670_v17, %v1389_v13  ;;  %v694_v20 = vpop.f32.mrb[20].mxu1  ;;  %v1045_v21 = vpop.f32.mrb[21].mxu0 }
 0x120   :  { %v695_v22 = vadd.f32 %v694_v20, %v622_v61  ;;  %v1057_v23 = vpop.f32.mrb[21].mxu1  ;;  %v673_v24 = vpop.f32.mrb[22].mxu0 }
 0x121   :  { %vm709_vm2 = vcmp.gt.f32.partialorder %v671_v19, 0.0  ;;  %v719_v25 = vmul.f32 0.01, %v671_v19  ;;  %v674_v27 = vadd.f32 %v673_v24, %v1391_v15  ;;  %v697_v63 = vpop.f32.mrb[22].mxu1  ;;  %v1046_v28 = vpop.f32.mrb[23].mxu0 }
 0x122   :  { %v698_v30 = vadd.f32 %v697_v63, %v625_v0  ;;  %v1058_v32 = vpop.f32.mrb[23].mxu1  ;;  %v725_v41 = vmul.f32 0.01, %v695_v22  ;;  %vm715_vm4 = vcmp.gt.f32.partialorder %v695_v22, 0.0  ;;  %v743_v28 = vld [vmem:[%s1470_s4 + $0x20] sm:$0xff] }
 0x123   :  { %v729_v33 = vsel %vm709_vm2, %v671_v19, %v719_v25  ;;  %vm710_vm3 = vcmp.gt.f32.partialorder %v674_v27, 0.0  ;;  %v720_v13 = vmul.f32 0.01, %v674_v27 }
 0x124   :  { %v744_v34 = vmul.f32 %v1413_v26, %v729_v33  ;;  %v735_v0 = vsel %vm715_vm4, %v695_v22, %v725_v41  ;;  %v726_v1 = vmul.f32 0.01, %v698_v30  ;;  %vm716_vm6 = vcmp.gt.f32.partialorder %v698_v30, 0.0 }
 0x125   :  { %v730_v37 = vsel %vm710_vm3, %v674_v27, %v720_v13  ;;  %v750_v9 = vmul.f32 %v740_v36, %v735_v0 }
 0x126   :  { %v745_v15 = vmul.f32 %v740_v36, %v730_v37  ;;  %v678_v38 = vpop.f32.mrb[24].mxu0  ;;  %v759_v39 = vmul.f32 %v1420_v35, %v744_v34  ;;  %v820_v40 = vmul.f32 %v744_v34, %v744_v34  ;;  %v736_v14 = vsel %vm716_vm6, %v698_v30, %v726_v1 }
 0x127   :  { %v679_v43 = vadd.f32 %v678_v38, %v1395_v29  ;;  %v702_v44 = vpop.f32.mrb[24].mxu1  ;;  %v1049_v46 = vpop.f32.mrb[25].mxu0  ;;  %v741_v29 = vld [vmem:[%s1470_s4 + $0x10] sm:$0xff]  ;;  %v765_v41 = vmul.f32 %v1429_v42, %v750_v9 }
 0x128   :  { %v760_v48 = vmul.f32 %v1429_v42, %v745_v15  ;;  %v795_v49 = vadd.f32 %v745_v15, %v744_v34  ;;  %v821_v50 = vmul.f32 %v745_v15, %v745_v15  ;;  %v703_v51 = vadd.f32 %v702_v44, %v630_v16  ;;  %v1061_v52 = vpop.f32.mrb[25].mxu1  ;;  %v681_v53 = vpop.f32.mrb[26].mxu0 }
 0x129   :  { %vm711_vm5 = vcmp.gt.f32.partialorder %v679_v43, 0.0  ;;  %v721_v54 = vmul.f32 0.01, %v679_v43  ;;  %v705_v55 = vpop.f32.mrb[26].mxu1  ;;  %v1050_v56 = vpop.f32.mrb[27].mxu0  ;;  %v682_v61 = vadd.f32 %v681_v53, %v1397_v31  ;;  %v742_v31 = vld [vmem:[%s1470_s4 + $0x18] sm:$0xff]  ;;  %v751_v36 = vmul.f32 %v741_v29, %v736_v14 }
 0x12a   :  { %v769_v57 = vadd.f32 %v760_v48, %v759_v39  ;;  %v830_v58 = vadd.f32 %v821_v50, %v820_v40  ;;  %v1062_v59 = vpop.f32.mrb[27].mxu1  ;;  %v706_v62 = vadd.f32 %v705_v55, %v633_v18  ;;  %v757_v18 = vld [vmem:[%s1471_s3 + $0x18] sm:$0xff]  ;;  %v727_v21 = vmul.f32 0.01, %v703_v51 }
 0x12b   :  { %v731_v60 = vsel %vm711_vm5, %v679_v43, %v721_v54  ;;  %vm712_vm7 = vcmp.gt.f32.partialorder %v682_v61, 0.0  ;;  %v722_v4 = vmul.f32 0.01, %v682_v61  ;;  %vm717_vm9 = vcmp.gt.f32.partialorder %v703_v51, 0.0 }
 0x12c   :  { %v746_v2 = vmul.f32 %v741_v29, %v731_v60  ;;  %vm718_vm10 = vcmp.gt.f32.partialorder %v706_v62, 0.0  ;;  %v728_v63 = vmul.f32 0.01, %v706_v62  ;;  %v737_v37 = vsel %vm717_vm9, %v703_v51, %v727_v21 }
 0x12d   :  { %v732_v10 = vsel %vm712_vm7, %v682_v61, %v722_v4  ;;  %v826_v43 = vmul.f32 %v750_v9, %v750_v9  ;;  %v752_v48 = vmul.f32 %v742_v31, %v737_v37  ;;  %v766_v51 = vmul.f32 %v756_v3, %v751_v36 }
 0x12e   :  { %v761_v5 = vmul.f32 %v756_v3, %v746_v2  ;;  %v796_v6 = vadd.f32 %v795_v49, %v746_v2  ;;  %v822_v7 = vmul.f32 %v746_v2, %v746_v2  ;;  %v686_v8 = vpop.f32.mrb[28].mxu0  ;;  %v747_v19 = vmul.f32 %v742_v31, %v732_v10 }
 0x12f   :  { %v687_v11 = vadd.f32 %v686_v8, %v1401_v45  ;;  %v1053_v12 = vpop.f32.mrb[29].mxu0  ;;  %v738_v44 = vsel %vm718_vm10, %v706_v62, %v728_v63  ;;  %v827_v56 = vmul.f32 %v751_v36, %v751_v36  ;;  %v767_v62 = vmul.f32 %v757_v18, %v752_v48 }
 0x130   :  { %v770_v16 = vadd.f32 %v769_v57, %v761_v5  ;;  %v831_v17 = vadd.f32 %v830_v58, %v822_v7  ;;  %v689_v20 = vpop.f32.mrb[30].mxu0  ;;  %v762_v25 = vmul.f32 %v757_v18, %v747_v19  ;;  %v797_v27 = vadd.f32 %v796_v6, %v747_v19 }
 0x131   :  { %vm713_vm8 = vcmp.gt.f32.partialorder %v687_v11, 0.0  ;;  %v723_v22 = vmul.f32 0.01, %v687_v11  ;;  %v690_v23 = vadd.f32 %v689_v20, %v1403_v47  ;;  %v1054_v24 = vpop.f32.mrb[31].mxu0  ;;  %v823_v45 = vmul.f32 %v747_v19, %v747_v19  ;;  %v758_v47 = vld [vmem:[%s1471_s3 + $0x20] sm:$0xff] }
 0x132   :  { %v771_v32 = vadd.f32 %v770_v16, %v762_v25  ;;  %v753_v57 = vmul.f32 %v743_v28, %v738_v44  ;;  %v828_v0 = vmul.f32 %v752_v48, %v752_v48 }
 0x133   :  { %v733_v30 = vsel %vm713_vm8, %v687_v11, %v723_v22  ;;  %vm714_vm11 = vcmp.gt.f32.partialorder %v690_v23, 0.0  ;;  %v832_v33 = vadd.f32 %v831_v17, %v823_v45  ;;  %v724_v34 = vmul.f32 0.01, %v690_v23 }
 0x134   :  { %v748_v13 = vmul.f32 %v743_v28, %v733_v30  ;;  %v768_v3 = vmul.f32 %v758_v47, %v753_v57  ;;  %v829_v6 = vmul.f32 %v753_v57, %v753_v57 }
 0x135   :  { %v734_v40 = vsel %vm714_vm11, %v690_v23, %v724_v34 }
 0x136   :  { %v763_v15 = vmul.f32 %v758_v47, %v748_v13  ;;  %v798_v38 = vadd.f32 %v797_v27, %v748_v13  ;;  %v824_v39 = vmul.f32 %v748_v13, %v748_v13  ;;  %v749_v46 = vmul.f32 %v1413_v26, %v734_v40 }
 0x138   :  { %v772_v49 = vadd.f32 %v771_v32, %v763_v15  ;;  %v799_v50 = vrot.slane %v798_v38, 4  ;;  %v833_v52 = vadd.f32 %v832_v33, %v824_v39  ;;  %v764_v53 = vmul.f32 %v1420_v35, %v749_v46 }
 0x139   :  { %v805_v54 = vadd.f32 %v750_v9, %v749_v46  ;;  %v825_v55 = vmul.f32 %v749_v46, %v749_v46 }
 0x13a   :  { %v773_v58 = vrot.slane %v772_v49, 4  ;;  %v834_v59 = vrot.slane %v833_v52, 4  ;;  %v800_v29 = vadd.f32 %v799_v50, %v798_v38  ;;  %v779_v42 = vadd.f32 %v765_v41, %v764_v53 }
 0x13b   :  { %v806_v60 = vadd.f32 %v805_v54, %v751_v36  ;;  %v840_v61 = vadd.f32 %v826_v43, %v825_v55 }
 0x13c   :  { %v774_v26 = vadd.f32 %v773_v58, %v772_v49  ;;  %v835_v1 = vadd.f32 %v834_v59, %v833_v52  ;;  %v780_v2 = vadd.f32 %v779_v42, %v766_v51  ;;  %v801_v35 = vrot.slane %v800_v29, 2 }
 0x13d   :  { %v807_v4 = vadd.f32 %v806_v60, %v752_v48  ;;  %v841_v5 = vadd.f32 %v840_v61, %v827_v56 }
 0x13e   :  { %v781_v7 = vadd.f32 %v780_v2, %v767_v62  ;;  %v775_v31 = vrot.slane %v774_v26, 2  ;;  %v836_v10 = vrot.slane %v835_v1, 2  ;;  %v802_v16 = vadd.f32 %v801_v35, %v800_v29 }
 0x13f   :  { %v808_v8 = vadd.f32 %v807_v4, %v753_v57  ;;  %v842_v9 = vadd.f32 %v841_v5, %v828_v0 }
 0x140   :  { %v782_v11 = vadd.f32 %v781_v7, %v768_v3  ;;  %v776_v20 = vadd.f32 %v775_v31, %v774_v26  ;;  %v837_v21 = vadd.f32 %v836_v10, %v835_v1  ;;  %v803_v25 = vrot.slane %v802_v16, 1 }
 0x141   :  { %v809_v12 = vrot.slane %v808_v8, 4  ;;  %v843_v14 = vadd.f32 %v842_v9, %v829_v6 }
 0x142   :  { %v783_v17 = vrot.slane %v782_v11, 4  ;;  %v777_v28 = vrot.slane %v776_v20, 1  ;;  %v838_v30 = vrot.slane %v837_v21, 1  ;;  %v804_v34 = vadd.f32 %v803_v25, %v802_v16 }
 0x143   :  { %v810_v18 = vadd.f32 %v809_v12, %v808_v8  ;;  %v844_v19 = vrot.slane %v843_v14, 4 }
 0x144   :  { %v784_v22 = vadd.f32 %v783_v17, %v782_v11  ;;  %v778_v15 = vadd.f32 %v777_v28, %v776_v20  ;;  %v839_v38 = vadd.f32 %v838_v30, %v837_v21 }
 0x145   :  { %v811_v23 = vrot.slane %v810_v18, 2  ;;  %v845_v24 = vadd.f32 %v844_v19, %v843_v14 }
 0x146   :  { %v785_v27 = vrot.slane %v784_v22, 2 }
 0x147   :  { %v812_v45 = vadd.f32 %v811_v23, %v810_v18  ;;  %v846_v63 = vrot.slane %v845_v24, 2 }
 0x148   :  { %v786_v32 = vadd.f32 %v785_v27, %v784_v22 }
 0x149   :  { %v813_v33 = vrot.slane %v812_v45, 1  ;;  %v847_v13 = vadd.f32 %v846_v63, %v845_v24 }
 0x14a   :  { %v787_v36 = vrot.slane %v786_v32, 1 }
 0x14b   :  { %v814_v37 = vadd.f32 %v813_v33, %v812_v45  ;;  %v848_v47 = vrot.slane %v847_v13, 1 }
 0x14c   :  { %v788_v39 = vadd.f32 %v787_v36, %v786_v32 }
 0x14d   :  { %v817_v40 = vsel %vm791_vm12, %v814_v37, %v804_v34  ;;  %v849_v41 = vadd.f32 %v848_v47, %v847_v13 }
 0x14e   :  { %819 = vst [vmem:[%s1472_s6] sm:$0x3] %v817_v40  ;;  %v792_v43 = vsel %vm791_vm12, %v788_v39, %v778_v15 }
 0x14f   :  { %v852_v44 = vsel %vm791_vm12, %v849_v41, %v839_v38  ;;  %794 = vst [vmem:[%s1473_s5] sm:$0x3] %v792_v43 }
 0x150   :  { %854 = vst [vmem:[%s1474_s7] sm:$0x3] %v852_v44 }

</bundles_post_ra>
